<compile_context>
chip_gen: v7x
topology: tpu7x:2x2x1
jax: 0.10.0
libtpu: 0.0.40
codegen_flags: <defaults>
</compile_context>

<pallas_src>
import jax
import jax.numpy as jnp
from jax.experimental import pallas as pl
from jax.experimental.pallas import tpu as pltpu

VMEM_LIMIT_BYTES = 32 * 1024 * 1024  # safe on v5e/v6e (128 MiB) and v7x (64 MiB)


def make_attention_kernel(num_heads, head_dim, seq_len, block_b, compute_dtype):
    H, D, N, Bt = num_heads, head_dim, seq_len, block_b
    C = H * D
    cdt = compute_dtype

    def kernel(x_ref, wqkv_ref, wph_ref, bp_ref, o_ref):
        # ---- 1. fused QKV projection: one (Bt*N, C) @ (C, 3C) MXU matmul ----
        # Leading-dim merge is layout-preserving when N % 8 == 0 (f32 sublanes).
        x2 = x_ref[...].reshape(Bt * N, C)
        qkv = jnp.dot(x2, wqkv_ref[...],
                      preferred_element_type=jnp.float32).astype(cdt)   # (Bt*N, 3C)

        # ---- 2. q/k/v: three contiguous lane slices (weight cols are [Q|K|V]) --
        q = qkv[:, 0 * C:1 * C]
        k = qkv[:, 1 * C:2 * C]
        v = qkv[:, 2 * C:3 * C]

        # ---- 3. head split: one stack of per-head lane slices per tensor ------
        # (Bt*N, C) -> (H, Bt*N, D) -> (H*Bt, N, D); done once for the whole
        # batch block (not per batch element).
        def split_heads(t):
            t = jnp.stack([t[:, h * D:(h + 1) * D] for h in range(H)], axis=0)
            return t.reshape(H * Bt, N, D)   # layout-preserving regroup (N % 8 == 0)

        qh = split_heads(q)
        kh = split_heads(k)
        vh = split_heads(v)

        # ---- 4. attention for all (head, batch) pairs in batched einsums ------
        s = jnp.einsum('bnd,bmd->bnm', qh, kh,
                       preferred_element_type=jnp.float32)              # (H*Bt, N, N)
        s = s - jnp.max(s, axis=-1, keepdims=True)                      # f32 softmax
        p = jnp.exp(s)
        l = jnp.sum(p, axis=-1, keepdims=True)                          # (H*Bt, N, 1)
        ctx = jnp.einsum('bnm,bmd->bnd', p.astype(cdt), vh,
                         preferred_element_type=jnp.float32)            # (H*Bt, N, D)
        # Exact reciprocal (tiny operand) applied to the context, not the probs.
        ctx = (ctx * pl.reciprocal(l)).astype(cdt)

        # ---- 5. fused output projection + head reduction ----------------------
        # out[bn, :] = sum_h ctx[h, bn, :] @ WpT[h*D:(h+1)*D, :]
        # f32 accumulator over per-head MXU dots: no (H, N, C) intermediate and
        # no cross-head VPU sum.
        ctx3 = ctx.reshape(H, Bt * N, D)
        acc = jnp.dot(ctx3[0], wph_ref[0], preferred_element_type=jnp.float32)
        for h in range(1, H):
            acc = acc + jnp.dot(ctx3[h], wph_ref[h],
                                preferred_element_type=jnp.float32)
        out = acc + bp_ref[...].astype(jnp.float32)                     # (1, C) bcast

        # NOTE: for C < 128 a lane-dense (Bt, 1, N*C) store would avoid masked
        # partial stores, but the required (Bt*N, C)->(Bt, N*C) relayout reshape
        # is not reliably lowered by Mosaic, so the natural (Bt, N, C) layout is
        # kept (negligible at these shapes; C >= 128 in realistic ViT configs).
        o_ref[...] = out.reshape(Bt, N, C).astype(o_ref.dtype)

    return kernel


def _pick_block_b(B, N, C, H, act_itemsize, cdt_itemsize, budget_bytes):
    """Largest batch block that fits the VMEM budget; keep a 2-step grid only
    when half the batch still fills the 256-wide MXU (v7x megacore)."""
    def per_step_bytes(bt):
        m = bt * N
        act_io = 2 * 2 * m * C * act_itemsize        # x + out blocks, double-buffered
        qkv = m * 3 * C * cdt_itemsize               # fused projection output
        heads = 3 * m * C * cdt_itemsize             # q/k/v head-split copies
        scores = 2 * bt * H * N * N * 4              # scores + probs (f32)
        ctx = m * C * (4 + cdt_itemsize)             # f32 ctx + compute-dtype copy
        proj = m * C * 4                             # f32 accumulator
        return act_io + qkv + heads + scores + ctx + proj

    fits = [bt for bt in range(1, B + 1)
            if B % bt == 0 and per_step_bytes(bt) <= budget_bytes]
    if not fits:
        return 1
    bt = max(fits)
    half = B // 2
    if bt == B and B % 2 == 0 and half in fits and half * N >= 256:
        bt = half
    return bt


def attention_pallas(x, wq, wk, wv, wp, bp, num_heads, qk_scale=None,
                     block_b=None, compute_dtype=None):
    B, N, C = x.shape
    H = num_heads
    D = C // H
    assert H * D == C
    scale = qk_scale if qk_scale is not None else D ** (-0.5)

    # MXU operand dtype: defaults to the input dtype (f32 in -> f32 matmuls,
    # bf16 in -> bf16 matmuls, f32 accumulation).  Pass compute_dtype=bfloat16
    # for ~3-4x matmul throughput on v6e/v7x when the accuracy budget allows.
    cdt = jnp.dtype(compute_dtype) if compute_dtype is not None else x.dtype

    # --- wrapper-side (free) weight plumbing ---
    # nn.Linear stores W[out, in]; pre-transpose once.  Fold the qk scale into
    # Wq.  Column order is [Q(all heads) | K | V], head-major inside each, so
    # the kernel takes three contiguous lane slices.  Weights are cast to the
    # compute dtype so the MXU never sees mixed-precision operands.
    wqkv = jnp.concatenate([wq.T * scale, wk.T, wv.T], axis=1).astype(cdt)  # (C, 3C)
    wph = wp.T.reshape(H, D, C).astype(cdt)       # per-head rows of proj^T
    bp2 = bp.reshape(1, C).astype(jnp.float32)    # added to the f32 accumulator

    act_itemsize = jnp.dtype(x.dtype).itemsize
    cdt_itemsize = jnp.dtype(cdt).itemsize
    weight_bytes = (C * 3 * C + H * D * C + C) * max(cdt_itemsize, 4)
    budget = VMEM_LIMIT_BYTES - 2 * weight_bytes - (4 << 20)
    if block_b is None:
        block_b = _pick_block_b(B, N, C, H, act_itemsize, cdt_itemsize, budget)
    assert B % block_b == 0

    kernel = make_attention_kernel(H, D, N, block_b, cdt)

    def build_call(single_buffer_weights):
        def wspec(shape, index_map):
            if single_buffer_weights:
                # Grid-invariant operands: a second pipeline buffer is wasted VMEM.
                return pl.BlockSpec(shape, index_map, pipeline_mode=pl.Buffered(1))
            return pl.BlockSpec(shape, index_map)

        grid_spec = pltpu.PrefetchScalarGridSpec(
            num_scalar_prefetch=0,
            grid=(B // block_b,),
            in_specs=[
                pl.BlockSpec((block_b, N, C), lambda b: (b, 0, 0)),   # x
                wspec((C, 3 * C), lambda b: (0, 0)),                  # fused Wqkv^T (scaled)
                wspec((H, D, C), lambda b: (0, 0, 0)),                # Wproj^T per head
                wspec((1, C), lambda b: (0, 0)),                      # proj bias
            ],
            out_specs=pl.BlockSpec((block_b, N, C), lambda b: (b, 0, 0)),
        )
        return pl.pallas_call(
            kernel,
            out_shape=jax.ShapeDtypeStruct((B, N, C), x.dtype),
            grid_spec=grid_spec,
            compiler_params=pltpu.CompilerParams(
                dimension_semantics=("parallel",),
                vmem_limit_bytes=VMEM_LIMIT_BYTES),
        )

    try:
        return build_call(True)(x, wqkv, wph, bp2)
    except Exception:
        # Portability fallback for JAX versions without per-operand
        # pipeline_mode support: identical math, default double-buffering.
        return build_call(False)(x, wqkv, wph, bp2)


def attention_reference(x, wq, wk, wv, wp, bp, num_heads):
    """Plain-JAX reference mirroring the PyTorch forward."""
    B, N, C = x.shape
    D = C // num_heads
    scale = D ** (-0.5)
    q = (x @ wq.T).reshape(B, N, num_heads, D).transpose(0, 2, 1, 3)
    k = (x @ wk.T).reshape(B, N, num_heads, D).transpose(0, 2, 1, 3)
    v = (x @ wv.T).reshape(B, N, num_heads, D).transpose(0, 2, 1, 3)
    attn = jnp.einsum("bhnd,bhmd->bhnm", q, k) * scale
    attn = jax.nn.softmax(attn, axis=-1)
    out = jnp.einsum("bhnm,bhmd->bhnd", attn, v)
    out = out.transpose(0, 2, 1, 3).reshape(B, N, C)
    return out @ wp.T + bp[0]


if __name__ == "__main__":
    # Small shapes consistent with the module: dim=32, num_heads=8 (head_dim=4)
    B, N, C = 2, 8, 32
    num_heads = 8

    key = jax.random.PRNGKey(0)
    kx, kq, kk, kv, kp, kb = jax.random.split(key, 6)

    x = jax.random.normal(kx, (B, N, C), dtype=jnp.float32)
    # nn.Linear weights: shape (out_features, in_features) = (C, C)
    wq = jax.random.normal(kq, (C, C), dtype=jnp.float32) * 0.05
    wk = jax.random.normal(kk, (C, C), dtype=jnp.float32) * 0.05
    wv = jax.random.normal(kv, (C, C), dtype=jnp.float32) * 0.05
    wp = jax.random.normal(kp, (C, C), dtype=jnp.float32) * 0.05
    bp = jax.random.normal(kb, (1, C), dtype=jnp.float32) * 0.05

    out = attention_pallas(x, wq, wk, wv, wp, bp, num_heads)
    out = jax.block_until_ready(out)

    ref = attention_reference(x, wq, wk, wv, wp, bp, num_heads)
    assert out.shape == (B, N, C)
    # Tolerance covers TPU default (reduced-precision) f32 matmuls in the
    # XLA reference; the kernel's softmax normalization is now exact.
    assert jnp.allclose(out, ref, atol=1e-3, rtol=1e-3), (
        float(jnp.max(jnp.abs(out - ref))))

    print("KERNEL_OK")
</pallas_src>

<mosaic_0001>
module attributes {stable_mosaic.version = 11 : i64} {
  func.func @kernel(%arg0: i32, %arg1: memref<2x8x32xf32, #tpu.memory_space<vmem>>, %arg2: memref<32x96xf32, #tpu.memory_space<vmem>>, %arg3: memref<8x4x32xf32, #tpu.memory_space<vmem>>, %arg4: memref<1x32xf32, #tpu.memory_space<vmem>>, %arg5: memref<2x8x32xf32, #tpu.memory_space<vmem>>) attributes {dimension_semantics = [#tpu.dimension_semantics<parallel>], iteration_bounds = array<i64: 1>, scalar_prefetch = 0 : i64, scratch_operands = 0 : i64, tpu.core_type = #tpu.core_type<tc>, window_params = [{transform_indices = @transform_0, window_bounds = array<i64: 2, 8, 32>}, {pipeline_mode = #tpu.pipeline_mode<synchronous>, transform_indices = @transform_1, window_bounds = array<i64: 32, 96>}, {pipeline_mode = #tpu.pipeline_mode<synchronous>, transform_indices = @transform_2, window_bounds = array<i64: 8, 4, 32>}, {pipeline_mode = #tpu.pipeline_mode<synchronous>, transform_indices = @transform_3, window_bounds = array<i64: 1, 32>}, {transform_indices = @transform_4, window_bounds = array<i64: 2, 8, 32>}]} {
    %c0 = arith.constant 0 : index
    %c0_0 = arith.constant 0 : index
    %c0_1 = arith.constant 0 : index
    %0 = vector.load %arg1[%c0, %c0_0, %c0_1] : memref<2x8x32xf32, #tpu.memory_space<vmem>>, vector<2x8x32xf32>
    %1 = vector.shape_cast %0 : vector<2x8x32xf32> to vector<16x32xf32>
    %c0_2 = arith.constant 0 : index
    %c0_3 = arith.constant 0 : index
    %2 = vector.load %arg2[%c0_2, %c0_3] : memref<32x96xf32, #tpu.memory_space<vmem>>, vector<32x96xf32>
    %cst = arith.constant dense<0.000000e+00> : vector<16x96xf32>
    %3 = tpu.matmul %1, %2, %cst {dimension_numbers = #tpu.dot_dimension_numbers<[1], [0], [0], [1], [0, 0, 1, 1], [], []>} : vector<16x32xf32>, vector<32x96xf32>, vector<16x96xf32> -> vector<16x96xf32>
    %4 = vector.extract_strided_slice %3 {offsets = [0, 0], sizes = [16, 32], strides = [1, 1]} : vector<16x96xf32> to vector<16x32xf32>
    %5 = vector.extract_strided_slice %3 {offsets = [0, 32], sizes = [16, 32], strides = [1, 1]} : vector<16x96xf32> to vector<16x32xf32>
    %6 = vector.extract_strided_slice %3 {offsets = [0, 64], sizes = [16, 32], strides = [1, 1]} : vector<16x96xf32> to vector<16x32xf32>
    %7 = vector.extract_strided_slice %4 {offsets = [0, 0], sizes = [16, 4], strides = [1, 1]} : vector<16x32xf32> to vector<16x4xf32>
    %8 = vector.extract_strided_slice %4 {offsets = [0, 4], sizes = [16, 4], strides = [1, 1]} : vector<16x32xf32> to vector<16x4xf32>
    %9 = vector.extract_strided_slice %4 {offsets = [0, 8], sizes = [16, 4], strides = [1, 1]} : vector<16x32xf32> to vector<16x4xf32>
    %10 = vector.extract_strided_slice %4 {offsets = [0, 12], sizes = [16, 4], strides = [1, 1]} : vector<16x32xf32> to vector<16x4xf32>
    %11 = vector.extract_strided_slice %4 {offsets = [0, 16], sizes = [16, 4], strides = [1, 1]} : vector<16x32xf32> to vector<16x4xf32>
    %12 = vector.extract_strided_slice %4 {offsets = [0, 20], sizes = [16, 4], strides = [1, 1]} : vector<16x32xf32> to vector<16x4xf32>
    %13 = vector.extract_strided_slice %4 {offsets = [0, 24], sizes = [16, 4], strides = [1, 1]} : vector<16x32xf32> to vector<16x4xf32>
    %14 = vector.extract_strided_slice %4 {offsets = [0, 28], sizes = [16, 4], strides = [1, 1]} : vector<16x32xf32> to vector<16x4xf32>
    %15 = vector.shape_cast %7 : vector<16x4xf32> to vector<1x16x4xf32>
    %16 = vector.shape_cast %8 : vector<16x4xf32> to vector<1x16x4xf32>
    %17 = vector.shape_cast %9 : vector<16x4xf32> to vector<1x16x4xf32>
    %18 = vector.shape_cast %10 : vector<16x4xf32> to vector<1x16x4xf32>
    %19 = vector.shape_cast %11 : vector<16x4xf32> to vector<1x16x4xf32>
    %20 = vector.shape_cast %12 : vector<16x4xf32> to vector<1x16x4xf32>
    %21 = vector.shape_cast %13 : vector<16x4xf32> to vector<1x16x4xf32>
    %22 = vector.shape_cast %14 : vector<16x4xf32> to vector<1x16x4xf32>
    %23 = tpu.concatenate %15, %16, %17, %18, %19, %20, %21, %22 in 0 : vector<1x16x4xf32>, vector<1x16x4xf32>, vector<1x16x4xf32>, vector<1x16x4xf32>, vector<1x16x4xf32>, vector<1x16x4xf32>, vector<1x16x4xf32>, vector<1x16x4xf32> -> vector<8x16x4xf32>
    %24 = vector.shape_cast %23 : vector<8x16x4xf32> to vector<16x8x4xf32>
    %25 = vector.extract_strided_slice %5 {offsets = [0, 0], sizes = [16, 4], strides = [1, 1]} : vector<16x32xf32> to vector<16x4xf32>
    %26 = vector.extract_strided_slice %5 {offsets = [0, 4], sizes = [16, 4], strides = [1, 1]} : vector<16x32xf32> to vector<16x4xf32>
    %27 = vector.extract_strided_slice %5 {offsets = [0, 8], sizes = [16, 4], strides = [1, 1]} : vector<16x32xf32> to vector<16x4xf32>
    %28 = vector.extract_strided_slice %5 {offsets = [0, 12], sizes = [16, 4], strides = [1, 1]} : vector<16x32xf32> to vector<16x4xf32>
    %29 = vector.extract_strided_slice %5 {offsets = [0, 16], sizes = [16, 4], strides = [1, 1]} : vector<16x32xf32> to vector<16x4xf32>
    %30 = vector.extract_strided_slice %5 {offsets = [0, 20], sizes = [16, 4], strides = [1, 1]} : vector<16x32xf32> to vector<16x4xf32>
    %31 = vector.extract_strided_slice %5 {offsets = [0, 24], sizes = [16, 4], strides = [1, 1]} : vector<16x32xf32> to vector<16x4xf32>
    %32 = vector.extract_strided_slice %5 {offsets = [0, 28], sizes = [16, 4], strides = [1, 1]} : vector<16x32xf32> to vector<16x4xf32>
    %33 = vector.shape_cast %25 : vector<16x4xf32> to vector<1x16x4xf32>
    %34 = vector.shape_cast %26 : vector<16x4xf32> to vector<1x16x4xf32>
    %35 = vector.shape_cast %27 : vector<16x4xf32> to vector<1x16x4xf32>
    %36 = vector.shape_cast %28 : vector<16x4xf32> to vector<1x16x4xf32>
    %37 = vector.shape_cast %29 : vector<16x4xf32> to vector<1x16x4xf32>
    %38 = vector.shape_cast %30 : vector<16x4xf32> to vector<1x16x4xf32>
    %39 = vector.shape_cast %31 : vector<16x4xf32> to vector<1x16x4xf32>
    %40 = vector.shape_cast %32 : vector<16x4xf32> to vector<1x16x4xf32>
    %41 = tpu.concatenate %33, %34, %35, %36, %37, %38, %39, %40 in 0 : vector<1x16x4xf32>, vector<1x16x4xf32>, vector<1x16x4xf32>, vector<1x16x4xf32>, vector<1x16x4xf32>, vector<1x16x4xf32>, vector<1x16x4xf32>, vector<1x16x4xf32> -> vector<8x16x4xf32>
    %42 = vector.shape_cast %41 : vector<8x16x4xf32> to vector<16x8x4xf32>
    %43 = vector.extract_strided_slice %6 {offsets = [0, 0], sizes = [16, 4], strides = [1, 1]} : vector<16x32xf32> to vector<16x4xf32>
    %44 = vector.extract_strided_slice %6 {offsets = [0, 4], sizes = [16, 4], strides = [1, 1]} : vector<16x32xf32> to vector<16x4xf32>
    %45 = vector.extract_strided_slice %6 {offsets = [0, 8], sizes = [16, 4], strides = [1, 1]} : vector<16x32xf32> to vector<16x4xf32>
    %46 = vector.extract_strided_slice %6 {offsets = [0, 12], sizes = [16, 4], strides = [1, 1]} : vector<16x32xf32> to vector<16x4xf32>
    %47 = vector.extract_strided_slice %6 {offsets = [0, 16], sizes = [16, 4], strides = [1, 1]} : vector<16x32xf32> to vector<16x4xf32>
    %48 = vector.extract_strided_slice %6 {offsets = [0, 20], sizes = [16, 4], strides = [1, 1]} : vector<16x32xf32> to vector<16x4xf32>
    %49 = vector.extract_strided_slice %6 {offsets = [0, 24], sizes = [16, 4], strides = [1, 1]} : vector<16x32xf32> to vector<16x4xf32>
    %50 = vector.extract_strided_slice %6 {offsets = [0, 28], sizes = [16, 4], strides = [1, 1]} : vector<16x32xf32> to vector<16x4xf32>
    %51 = vector.shape_cast %43 : vector<16x4xf32> to vector<1x16x4xf32>
    %52 = vector.shape_cast %44 : vector<16x4xf32> to vector<1x16x4xf32>
    %53 = vector.shape_cast %45 : vector<16x4xf32> to vector<1x16x4xf32>
    %54 = vector.shape_cast %46 : vector<16x4xf32> to vector<1x16x4xf32>
    %55 = vector.shape_cast %47 : vector<16x4xf32> to vector<1x16x4xf32>
    %56 = vector.shape_cast %48 : vector<16x4xf32> to vector<1x16x4xf32>
    %57 = vector.shape_cast %49 : vector<16x4xf32> to vector<1x16x4xf32>
    %58 = vector.shape_cast %50 : vector<16x4xf32> to vector<1x16x4xf32>
    %59 = tpu.concatenate %51, %52, %53, %54, %55, %56, %57, %58 in 0 : vector<1x16x4xf32>, vector<1x16x4xf32>, vector<1x16x4xf32>, vector<1x16x4xf32>, vector<1x16x4xf32>, vector<1x16x4xf32>, vector<1x16x4xf32>, vector<1x16x4xf32> -> vector<8x16x4xf32>
    %60 = vector.shape_cast %59 : vector<8x16x4xf32> to vector<16x8x4xf32>
    "tpu.trace_start"() <{level = 10 : i32, message = "bnd,bmd->bnm"}> : () -> ()
    %cst_4 = arith.constant dense<0.000000e+00> : vector<16x8x8xf32>
    %61 = tpu.matmul %24, %42, %cst_4 {dimension_numbers = #tpu.dot_dimension_numbers<[2], [2], [1], [1], [0, 0, 0, 1, 1, 1], [0], [0]>} : vector<16x8x4xf32>, vector<16x8x4xf32>, vector<16x8x8xf32> -> vector<16x8x8xf32>
    "tpu.trace_stop"() : () -> ()
    %cst_5 = arith.constant dense<0xFF800000> : vector<16x8xf32>
    %62 = vector.multi_reduction <maximumf>, %61, %cst_5 [2] : vector<16x8x8xf32> to vector<16x8xf32>
    %63 = vector.shape_cast %62 : vector<16x8xf32> to vector<16x8x1xf32>
    %64 = vector.broadcast %63 : vector<16x8x1xf32> to vector<16x8x8xf32>
    %65 = arith.subf %61, %64 : vector<16x8x8xf32>
    %66 = math.exp %65 : vector<16x8x8xf32>
    %cst_6 = arith.constant dense<0.000000e+00> : vector<16x8xf32>
    %67 = vector.multi_reduction <add>, %66, %cst_6 [2] : vector<16x8x8xf32> to vector<16x8xf32>
    %68 = vector.shape_cast %67 : vector<16x8xf32> to vector<16x8x1xf32>
    "tpu.trace_start"() <{level = 10 : i32, message = "bnm,bmd->bnd"}> : () -> ()
    %cst_7 = arith.constant dense<0.000000e+00> : vector<16x8x4xf32>
    %69 = tpu.matmul %66, %60, %cst_7 {dimension_numbers = #tpu.dot_dimension_numbers<[2], [1], [1], [2], [0, 0, 0, 1, 1, 2], [0], [0]>} : vector<16x8x8xf32>, vector<16x8x4xf32>, vector<16x8x4xf32> -> vector<16x8x4xf32>
    "tpu.trace_stop"() : () -> ()
    %70 = tpu.reciprocal %68 : vector<16x8x1xf32> -> vector<16x8x1xf32>
    %71 = vector.broadcast %70 : vector<16x8x1xf32> to vector<16x8x4xf32>
    %72 = arith.mulf %69, %71 : vector<16x8x4xf32>
    %73 = vector.shape_cast %72 : vector<16x8x4xf32> to vector<8x16x4xf32>
    %74 = vector.extract_strided_slice %73 {offsets = [0, 0, 0], sizes = [1, 16, 4], strides = [1, 1, 1]} : vector<8x16x4xf32> to vector<1x16x4xf32>
    %75 = vector.shape_cast %74 : vector<1x16x4xf32> to vector<16x4xf32>
    %c0_8 = arith.constant 0 : index
    %c0_9 = arith.constant 0 : index
    %c0_10 = arith.constant 0 : index
    %76 = vector.load %arg3[%c0_8, %c0_9, %c0_10] : memref<8x4x32xf32, #tpu.memory_space<vmem>>, vector<1x4x32xf32>
    %77 = vector.shape_cast %76 : vector<1x4x32xf32> to vector<4x32xf32>
    %cst_11 = arith.constant dense<0.000000e+00> : vector<16x32xf32>
    %78 = tpu.matmul %75, %77, %cst_11 {dimension_numbers = #tpu.dot_dimension_numbers<[1], [0], [0], [1], [0, 0, 1, 1], [], []>} : vector<16x4xf32>, vector<4x32xf32>, vector<16x32xf32> -> vector<16x32xf32>
    %79 = vector.extract_strided_slice %73 {offsets = [1, 0, 0], sizes = [1, 16, 4], strides = [1, 1, 1]} : vector<8x16x4xf32> to vector<1x16x4xf32>
    %80 = vector.shape_cast %79 : vector<1x16x4xf32> to vector<16x4xf32>
    %c1 = arith.constant 1 : index
    %c0_12 = arith.constant 0 : index
    %c0_13 = arith.constant 0 : index
    %81 = vector.load %arg3[%c1, %c0_12, %c0_13] : memref<8x4x32xf32, #tpu.memory_space<vmem>>, vector<1x4x32xf32>
    %82 = vector.shape_cast %81 : vector<1x4x32xf32> to vector<4x32xf32>
    %cst_14 = arith.constant dense<0.000000e+00> : vector<16x32xf32>
    %83 = tpu.matmul %80, %82, %cst_14 {dimension_numbers = #tpu.dot_dimension_numbers<[1], [0], [0], [1], [0, 0, 1, 1], [], []>} : vector<16x4xf32>, vector<4x32xf32>, vector<16x32xf32> -> vector<16x32xf32>
    %84 = arith.addf %78, %83 : vector<16x32xf32>
    %85 = vector.extract_strided_slice %73 {offsets = [2, 0, 0], sizes = [1, 16, 4], strides = [1, 1, 1]} : vector<8x16x4xf32> to vector<1x16x4xf32>
    %86 = vector.shape_cast %85 : vector<1x16x4xf32> to vector<16x4xf32>
    %c2 = arith.constant 2 : index
    %c0_15 = arith.constant 0 : index
    %c0_16 = arith.constant 0 : index
    %87 = vector.load %arg3[%c2, %c0_15, %c0_16] : memref<8x4x32xf32, #tpu.memory_space<vmem>>, vector<1x4x32xf32>
    %88 = vector.shape_cast %87 : vector<1x4x32xf32> to vector<4x32xf32>
    %cst_17 = arith.constant dense<0.000000e+00> : vector<16x32xf32>
    %89 = tpu.matmul %86, %88, %cst_17 {dimension_numbers = #tpu.dot_dimension_numbers<[1], [0], [0], [1], [0, 0, 1, 1], [], []>} : vector<16x4xf32>, vector<4x32xf32>, vector<16x32xf32> -> vector<16x32xf32>
    %90 = arith.addf %84, %89 : vector<16x32xf32>
    %91 = vector.extract_strided_slice %73 {offsets = [3, 0, 0], sizes = [1, 16, 4], strides = [1, 1, 1]} : vector<8x16x4xf32> to vector<1x16x4xf32>
    %92 = vector.shape_cast %91 : vector<1x16x4xf32> to vector<16x4xf32>
    %c3 = arith.constant 3 : index
    %c0_18 = arith.constant 0 : index
    %c0_19 = arith.constant 0 : index
    %93 = vector.load %arg3[%c3, %c0_18, %c0_19] : memref<8x4x32xf32, #tpu.memory_space<vmem>>, vector<1x4x32xf32>
    %94 = vector.shape_cast %93 : vector<1x4x32xf32> to vector<4x32xf32>
    %cst_20 = arith.constant dense<0.000000e+00> : vector<16x32xf32>
    %95 = tpu.matmul %92, %94, %cst_20 {dimension_numbers = #tpu.dot_dimension_numbers<[1], [0], [0], [1], [0, 0, 1, 1], [], []>} : vector<16x4xf32>, vector<4x32xf32>, vector<16x32xf32> -> vector<16x32xf32>
    %96 = arith.addf %90, %95 : vector<16x32xf32>
    %97 = vector.extract_strided_slice %73 {offsets = [4, 0, 0], sizes = [1, 16, 4], strides = [1, 1, 1]} : vector<8x16x4xf32> to vector<1x16x4xf32>
    %98 = vector.shape_cast %97 : vector<1x16x4xf32> to vector<16x4xf32>
    %c4 = arith.constant 4 : index
    %c0_21 = arith.constant 0 : index
    %c0_22 = arith.constant 0 : index
    %99 = vector.load %arg3[%c4, %c0_21, %c0_22] : memref<8x4x32xf32, #tpu.memory_space<vmem>>, vector<1x4x32xf32>
    %100 = vector.shape_cast %99 : vector<1x4x32xf32> to vector<4x32xf32>
    %cst_23 = arith.constant dense<0.000000e+00> : vector<16x32xf32>
    %101 = tpu.matmul %98, %100, %cst_23 {dimension_numbers = #tpu.dot_dimension_numbers<[1], [0], [0], [1], [0, 0, 1, 1], [], []>} : vector<16x4xf32>, vector<4x32xf32>, vector<16x32xf32> -> vector<16x32xf32>
    %102 = arith.addf %96, %101 : vector<16x32xf32>
    %103 = vector.extract_strided_slice %73 {offsets = [5, 0, 0], sizes = [1, 16, 4], strides = [1, 1, 1]} : vector<8x16x4xf32> to vector<1x16x4xf32>
    %104 = vector.shape_cast %103 : vector<1x16x4xf32> to vector<16x4xf32>
    %c5 = arith.constant 5 : index
    %c0_24 = arith.constant 0 : index
    %c0_25 = arith.constant 0 : index
    %105 = vector.load %arg3[%c5, %c0_24, %c0_25] : memref<8x4x32xf32, #tpu.memory_space<vmem>>, vector<1x4x32xf32>
    %106 = vector.shape_cast %105 : vector<1x4x32xf32> to vector<4x32xf32>
    %cst_26 = arith.constant dense<0.000000e+00> : vector<16x32xf32>
    %107 = tpu.matmul %104, %106, %cst_26 {dimension_numbers = #tpu.dot_dimension_numbers<[1], [0], [0], [1], [0, 0, 1, 1], [], []>} : vector<16x4xf32>, vector<4x32xf32>, vector<16x32xf32> -> vector<16x32xf32>
    %108 = arith.addf %102, %107 : vector<16x32xf32>
    %109 = vector.extract_strided_slice %73 {offsets = [6, 0, 0], sizes = [1, 16, 4], strides = [1, 1, 1]} : vector<8x16x4xf32> to vector<1x16x4xf32>
    %110 = vector.shape_cast %109 : vector<1x16x4xf32> to vector<16x4xf32>
    %c6 = arith.constant 6 : index
    %c0_27 = arith.constant 0 : index
    %c0_28 = arith.constant 0 : index
    %111 = vector.load %arg3[%c6, %c0_27, %c0_28] : memref<8x4x32xf32, #tpu.memory_space<vmem>>, vector<1x4x32xf32>
    %112 = vector.shape_cast %111 : vector<1x4x32xf32> to vector<4x32xf32>
    %cst_29 = arith.constant dense<0.000000e+00> : vector<16x32xf32>
    %113 = tpu.matmul %110, %112, %cst_29 {dimension_numbers = #tpu.dot_dimension_numbers<[1], [0], [0], [1], [0, 0, 1, 1], [], []>} : vector<16x4xf32>, vector<4x32xf32>, vector<16x32xf32> -> vector<16x32xf32>
    %114 = arith.addf %108, %113 : vector<16x32xf32>
    %115 = vector.extract_strided_slice %73 {offsets = [7, 0, 0], sizes = [1, 16, 4], strides = [1, 1, 1]} : vector<8x16x4xf32> to vector<1x16x4xf32>
    %116 = vector.shape_cast %115 : vector<1x16x4xf32> to vector<16x4xf32>
    %c7 = arith.constant 7 : index
    %c0_30 = arith.constant 0 : index
    %c0_31 = arith.constant 0 : index
    %117 = vector.load %arg3[%c7, %c0_30, %c0_31] : memref<8x4x32xf32, #tpu.memory_space<vmem>>, vector<1x4x32xf32>
    %118 = vector.shape_cast %117 : vector<1x4x32xf32> to vector<4x32xf32>
    %cst_32 = arith.constant dense<0.000000e+00> : vector<16x32xf32>
    %119 = tpu.matmul %116, %118, %cst_32 {dimension_numbers = #tpu.dot_dimension_numbers<[1], [0], [0], [1], [0, 0, 1, 1], [], []>} : vector<16x4xf32>, vector<4x32xf32>, vector<16x32xf32> -> vector<16x32xf32>
    %120 = arith.addf %114, %119 : vector<16x32xf32>
    %c0_33 = arith.constant 0 : index
    %c0_34 = arith.constant 0 : index
    %121 = vector.load %arg4[%c0_33, %c0_34] : memref<1x32xf32, #tpu.memory_space<vmem>>, vector<1x32xf32>
    %122 = vector.broadcast %121 : vector<1x32xf32> to vector<16x32xf32>
    %123 = arith.addf %120, %122 : vector<16x32xf32>
    %124 = vector.shape_cast %123 : vector<16x32xf32> to vector<2x8x32xf32>
    %c0_35 = arith.constant 0 : index
    %c0_36 = arith.constant 0 : index
    %c0_37 = arith.constant 0 : index
    %125 = vector.load %arg5[%c0_35, %c0_36, %c0_37] : memref<2x8x32xf32, #tpu.memory_space<vmem>>, vector<2x8x32xf32>
    tpu.vector_store %arg5[%c0_35, %c0_36, %c0_37], %124 {strides = array<i32>} : memref<2x8x32xf32, #tpu.memory_space<vmem>>, vector<2x8x32xf32>,
    return
  }
  func.func @transform_0(%arg0: i32) -> (i32, i32, i32) {
    %c0_i32 = arith.constant 0 : i32
    %c0_i32_0 = arith.constant 0 : i32
    %c0_i32_1 = arith.constant 0 : i32
    return %arg0, %c0_i32, %c0_i32_0 : i32, i32, i32
  }
  func.func @transform_1(%arg0: i32) -> (i32, i32) {
    %c0_i32 = arith.constant 0 : i32
    %c0_i32_0 = arith.constant 0 : i32
    %c0_i32_1 = arith.constant 0 : i32
    return %c0_i32, %c0_i32_0 : i32, i32
  }
  func.func @transform_2(%arg0: i32) -> (i32, i32, i32) {
    %c0_i32 = arith.constant 0 : i32
    %c0_i32_0 = arith.constant 0 : i32
    %c0_i32_1 = arith.constant 0 : i32
    %c0_i32_2 = arith.constant 0 : i32
    return %c0_i32, %c0_i32_0, %c0_i32_1 : i32, i32, i32
  }
  func.func @transform_3(%arg0: i32) -> (i32, i32) {
    %c0_i32 = arith.constant 0 : i32
    %c0_i32_0 = arith.constant 0 : i32
    %c0_i32_1 = arith.constant 0 : i32
    return %c0_i32, %c0_i32_0 : i32, i32
  }
  func.func @transform_4(%arg0: i32) -> (i32, i32, i32) {
    %c0_i32 = arith.constant 0 : i32
    %c0_i32_0 = arith.constant 0 : i32
    %c0_i32_1 = arith.constant 0 : i32
    return %arg0, %c0_i32, %c0_i32_0 : i32, i32, i32
  }
}

module attributes {stable_mosaic.version = 11 : i64} {
  func.func @kernel(%arg0: i32, %arg1: memref<2x8x32xf32, #tpu.memory_space<vmem>>, %arg2: memref<32x96xf32, #tpu.memory_space<vmem>>, %arg3: memref<8x4x32xf32, #tpu.memory_space<vmem>>, %arg4: memref<1x32xf32, #tpu.memory_space<vmem>>, %arg5: memref<2x8x32xf32, #tpu.memory_space<vmem>>) attributes {dimension_semantics = [#tpu.dimension_semantics<parallel>], iteration_bounds = array<i64: 1>, scalar_prefetch = 0 : i64, scratch_operands = 0 : i64, tpu.core_type = #tpu.core_type<tc>, window_params = [{transform_indices = @transform_0, window_bounds = array<i64: 2, 8, 32>}, {pipeline_mode = #tpu.pipeline_mode<synchronous>, transform_indices = @transform_1, window_bounds = array<i64: 32, 96>}, {pipeline_mode = #tpu.pipeline_mode<synchronous>, transform_indices = @transform_2, window_bounds = array<i64: 8, 4, 32>}, {pipeline_mode = #tpu.pipeline_mode<synchronous>, transform_indices = @transform_3, window_bounds = array<i64: 1, 32>}, {transform_indices = @transform_4, window_bounds = array<i64: 2, 8, 32>}]} {
    %c0 = arith.constant 0 : index
    %c0_0 = arith.constant 0 : index
    %c0_1 = arith.constant 0 : index
    %0 = vector.load %arg1[%c0, %c0_0, %c0_1] : memref<2x8x32xf32, #tpu.memory_space<vmem>>, vector<2x8x32xf32>
    %1 = vector.shape_cast %0 : vector<2x8x32xf32> to vector<16x32xf32>
    %c0_2 = arith.constant 0 : index
    %c0_3 = arith.constant 0 : index
    %2 = vector.load %arg2[%c0_2, %c0_3] : memref<32x96xf32, #tpu.memory_space<vmem>>, vector<32x96xf32>
    %cst = arith.constant dense<0.000000e+00> : vector<16x96xf32>
    %3 = tpu.matmul %1, %2, %cst {dimension_numbers = #tpu.dot_dimension_numbers<[1], [0], [0], [1], [0, 0, 1, 1], [], []>} : vector<16x32xf32>, vector<32x96xf32>, vector<16x96xf32> -> vector<16x96xf32>
    %4 = vector.extract_strided_slice %3 {offsets = [0, 0], sizes = [16, 32], strides = [1, 1]} : vector<16x96xf32> to vector<16x32xf32>
    %5 = vector.extract_strided_slice %3 {offsets = [0, 32], sizes = [16, 32], strides = [1, 1]} : vector<16x96xf32> to vector<16x32xf32>
    %6 = vector.extract_strided_slice %3 {offsets = [0, 64], sizes = [16, 32], strides = [1, 1]} : vector<16x96xf32> to vector<16x32xf32>
    %7 = vector.extract_strided_slice %4 {offsets = [0, 0], sizes = [16, 4], strides = [1, 1]} : vector<16x32xf32> to vector<16x4xf32>
    %8 = vector.extract_strided_slice %4 {offsets = [0, 4], sizes = [16, 4], strides = [1, 1]} : vector<16x32xf32> to vector<16x4xf32>
    %9 = vector.extract_strided_slice %4 {offsets = [0, 8], sizes = [16, 4], strides = [1, 1]} : vector<16x32xf32> to vector<16x4xf32>
    %10 = vector.extract_strided_slice %4 {offsets = [0, 12], sizes = [16, 4], strides = [1, 1]} : vector<16x32xf32> to vector<16x4xf32>
    %11 = vector.extract_strided_slice %4 {offsets = [0, 16], sizes = [16, 4], strides = [1, 1]} : vector<16x32xf32> to vector<16x4xf32>
    %12 = vector.extract_strided_slice %4 {offsets = [0, 20], sizes = [16, 4], strides = [1, 1]} : vector<16x32xf32> to vector<16x4xf32>
    %13 = vector.extract_strided_slice %4 {offsets = [0, 24], sizes = [16, 4], strides = [1, 1]} : vector<16x32xf32> to vector<16x4xf32>
    %14 = vector.extract_strided_slice %4 {offsets = [0, 28], sizes = [16, 4], strides = [1, 1]} : vector<16x32xf32> to vector<16x4xf32>
    %15 = vector.shape_cast %7 : vector<16x4xf32> to vector<1x16x4xf32>
    %16 = vector.shape_cast %8 : vector<16x4xf32> to vector<1x16x4xf32>
    %17 = vector.shape_cast %9 : vector<16x4xf32> to vector<1x16x4xf32>
    %18 = vector.shape_cast %10 : vector<16x4xf32> to vector<1x16x4xf32>
    %19 = vector.shape_cast %11 : vector<16x4xf32> to vector<1x16x4xf32>
    %20 = vector.shape_cast %12 : vector<16x4xf32> to vector<1x16x4xf32>
    %21 = vector.shape_cast %13 : vector<16x4xf32> to vector<1x16x4xf32>
    %22 = vector.shape_cast %14 : vector<16x4xf32> to vector<1x16x4xf32>
    %23 = tpu.concatenate %15, %16, %17, %18, %19, %20, %21, %22 in 0 : vector<1x16x4xf32>, vector<1x16x4xf32>, vector<1x16x4xf32>, vector<1x16x4xf32>, vector<1x16x4xf32>, vector<1x16x4xf32>, vector<1x16x4xf32>, vector<1x16x4xf32> -> vector<8x16x4xf32>
    %24 = vector.shape_cast %23 : vector<8x16x4xf32> to vector<16x8x4xf32>
    %25 = vector.extract_strided_slice %5 {offsets = [0, 0], sizes = [16, 4], strides = [1, 1]} : vector<16x32xf32> to vector<16x4xf32>
    %26 = vector.extract_strided_slice %5 {offsets = [0, 4], sizes = [16, 4], strides = [1, 1]} : vector<16x32xf32> to vector<16x4xf32>
    %27 = vector.extract_strided_slice %5 {offsets = [0, 8], sizes = [16, 4], strides = [1, 1]} : vector<16x32xf32> to vector<16x4xf32>
    %28 = vector.extract_strided_slice %5 {offsets = [0, 12], sizes = [16, 4], strides = [1, 1]} : vector<16x32xf32> to vector<16x4xf32>
    %29 = vector.extract_strided_slice %5 {offsets = [0, 16], sizes = [16, 4], strides = [1, 1]} : vector<16x32xf32> to vector<16x4xf32>
    %30 = vector.extract_strided_slice %5 {offsets = [0, 20], sizes = [16, 4], strides = [1, 1]} : vector<16x32xf32> to vector<16x4xf32>
    %31 = vector.extract_strided_slice %5 {offsets = [0, 24], sizes = [16, 4], strides = [1, 1]} : vector<16x32xf32> to vector<16x4xf32>
    %32 = vector.extract_strided_slice %5 {offsets = [0, 28], sizes = [16, 4], strides = [1, 1]} : vector<16x32xf32> to vector<16x4xf32>
    %33 = vector.shape_cast %25 : vector<16x4xf32> to vector<1x16x4xf32>
    %34 = vector.shape_cast %26 : vector<16x4xf32> to vector<1x16x4xf32>
    %35 = vector.shape_cast %27 : vector<16x4xf32> to vector<1x16x4xf32>
    %36 = vector.shape_cast %28 : vector<16x4xf32> to vector<1x16x4xf32>
    %37 = vector.shape_cast %29 : vector<16x4xf32> to vector<1x16x4xf32>
    %38 = vector.shape_cast %30 : vector<16x4xf32> to vector<1x16x4xf32>
    %39 = vector.shape_cast %31 : vector<16x4xf32> to vector<1x16x4xf32>
    %40 = vector.shape_cast %32 : vector<16x4xf32> to vector<1x16x4xf32>
    %41 = tpu.concatenate %33, %34, %35, %36, %37, %38, %39, %40 in 0 : vector<1x16x4xf32>, vector<1x16x4xf32>, vector<1x16x4xf32>, vector<1x16x4xf32>, vector<1x16x4xf32>, vector<1x16x4xf32>, vector<1x16x4xf32>, vector<1x16x4xf32> -> vector<8x16x4xf32>
    %42 = vector.shape_cast %41 : vector<8x16x4xf32> to vector<16x8x4xf32>
    %43 = vector.extract_strided_slice %6 {offsets = [0, 0], sizes = [16, 4], strides = [1, 1]} : vector<16x32xf32> to vector<16x4xf32>
    %44 = vector.extract_strided_slice %6 {offsets = [0, 4], sizes = [16, 4], strides = [1, 1]} : vector<16x32xf32> to vector<16x4xf32>
    %45 = vector.extract_strided_slice %6 {offsets = [0, 8], sizes = [16, 4], strides = [1, 1]} : vector<16x32xf32> to vector<16x4xf32>
    %46 = vector.extract_strided_slice %6 {offsets = [0, 12], sizes = [16, 4], strides = [1, 1]} : vector<16x32xf32> to vector<16x4xf32>
    %47 = vector.extract_strided_slice %6 {offsets = [0, 16], sizes = [16, 4], strides = [1, 1]} : vector<16x32xf32> to vector<16x4xf32>
    %48 = vector.extract_strided_slice %6 {offsets = [0, 20], sizes = [16, 4], strides = [1, 1]} : vector<16x32xf32> to vector<16x4xf32>
    %49 = vector.extract_strided_slice %6 {offsets = [0, 24], sizes = [16, 4], strides = [1, 1]} : vector<16x32xf32> to vector<16x4xf32>
    %50 = vector.extract_strided_slice %6 {offsets = [0, 28], sizes = [16, 4], strides = [1, 1]} : vector<16x32xf32> to vector<16x4xf32>
    %51 = vector.shape_cast %43 : vector<16x4xf32> to vector<1x16x4xf32>
    %52 = vector.shape_cast %44 : vector<16x4xf32> to vector<1x16x4xf32>
    %53 = vector.shape_cast %45 : vector<16x4xf32> to vector<1x16x4xf32>
    %54 = vector.shape_cast %46 : vector<16x4xf32> to vector<1x16x4xf32>
    %55 = vector.shape_cast %47 : vector<16x4xf32> to vector<1x16x4xf32>
    %56 = vector.shape_cast %48 : vector<16x4xf32> to vector<1x16x4xf32>
    %57 = vector.shape_cast %49 : vector<16x4xf32> to vector<1x16x4xf32>
    %58 = vector.shape_cast %50 : vector<16x4xf32> to vector<1x16x4xf32>
    %59 = tpu.concatenate %51, %52, %53, %54, %55, %56, %57, %58 in 0 : vector<1x16x4xf32>, vector<1x16x4xf32>, vector<1x16x4xf32>, vector<1x16x4xf32>, vector<1x16x4xf32>, vector<1x16x4xf32>, vector<1x16x4xf32>, vector<1x16x4xf32> -> vector<8x16x4xf32>
    %60 = vector.shape_cast %59 : vector<8x16x4xf32> to vector<16x8x4xf32>
    "tpu.trace_start"() <{level = 10 : i32, message = "bnd,bmd->bnm"}> : () -> ()
    %cst_4 = arith.constant dense<0.000000e+00> : vector<16x8x8xf32>
    %61 = tpu.matmul %24, %42, %cst_4 {dimension_numbers = #tpu.dot_dimension_numbers<[2], [2], [1], [1], [0, 0, 0, 1, 1, 1], [0], [0]>} : vector<16x8x4xf32>, vector<16x8x4xf32>, vector<16x8x8xf32> -> vector<16x8x8xf32>
    "tpu.trace_stop"() : () -> ()
    %cst_5 = arith.constant dense<0xFF800000> : vector<16x8xf32>
    %62 = vector.multi_reduction <maximumf>, %61, %cst_5 [2] : vector<16x8x8xf32> to vector<16x8xf32>
    %63 = vector.shape_cast %62 : vector<16x8xf32> to vector<16x8x1xf32>
    %64 = vector.broadcast %63 : vector<16x8x1xf32> to vector<16x8x8xf32>
    %65 = arith.subf %61, %64 : vector<16x8x8xf32>
    %66 = math.exp %65 : vector<16x8x8xf32>
    %cst_6 = arith.constant dense<0.000000e+00> : vector<16x8xf32>
    %67 = vector.multi_reduction <add>, %66, %cst_6 [2] : vector<16x8x8xf32> to vector<16x8xf32>
    %68 = vector.shape_cast %67 : vector<16x8xf32> to vector<16x8x1xf32>
    "tpu.trace_start"() <{level = 10 : i32, message = "bnm,bmd->bnd"}> : () -> ()
    %cst_7 = arith.constant dense<0.000000e+00> : vector<16x8x4xf32>
    %69 = tpu.matmul %66, %60, %cst_7 {dimension_numbers = #tpu.dot_dimension_numbers<[2], [1], [1], [2], [0, 0, 0, 1, 1, 2], [0], [0]>} : vector<16x8x8xf32>, vector<16x8x4xf32>, vector<16x8x4xf32> -> vector<16x8x4xf32>
    "tpu.trace_stop"() : () -> ()
    %70 = tpu.reciprocal %68 : vector<16x8x1xf32> -> vector<16x8x1xf32>
    %71 = vector.broadcast %70 : vector<16x8x1xf32> to vector<16x8x4xf32>
    %72 = arith.mulf %69, %71 : vector<16x8x4xf32>
    %73 = vector.shape_cast %72 : vector<16x8x4xf32> to vector<8x16x4xf32>
    %74 = vector.extract_strided_slice %73 {offsets = [0, 0, 0], sizes = [1, 16, 4], strides = [1, 1, 1]} : vector<8x16x4xf32> to vector<1x16x4xf32>
    %75 = vector.shape_cast %74 : vector<1x16x4xf32> to vector<16x4xf32>
    %c0_8 = arith.constant 0 : index
    %c0_9 = arith.constant 0 : index
    %c0_10 = arith.constant 0 : index
    %76 = vector.load %arg3[%c0_8, %c0_9, %c0_10] : memref<8x4x32xf32, #tpu.memory_space<vmem>>, vector<1x4x32xf32>
    %77 = vector.shape_cast %76 : vector<1x4x32xf32> to vector<4x32xf32>
    %cst_11 = arith.constant dense<0.000000e+00> : vector<16x32xf32>
    %78 = tpu.matmul %75, %77, %cst_11 {dimension_numbers = #tpu.dot_dimension_numbers<[1], [0], [0], [1], [0, 0, 1, 1], [], []>} : vector<16x4xf32>, vector<4x32xf32>, vector<16x32xf32> -> vector<16x32xf32>
    %79 = vector.extract_strided_slice %73 {offsets = [1, 0, 0], sizes = [1, 16, 4], strides = [1, 1, 1]} : vector<8x16x4xf32> to vector<1x16x4xf32>
    %80 = vector.shape_cast %79 : vector<1x16x4xf32> to vector<16x4xf32>
    %c1 = arith.constant 1 : index
    %c0_12 = arith.constant 0 : index
    %c0_13 = arith.constant 0 : index
    %81 = vector.load %arg3[%c1, %c0_12, %c0_13] : memref<8x4x32xf32, #tpu.memory_space<vmem>>, vector<1x4x32xf32>
    %82 = vector.shape_cast %81 : vector<1x4x32xf32> to vector<4x32xf32>
    %cst_14 = arith.constant dense<0.000000e+00> : vector<16x32xf32>
    %83 = tpu.matmul %80, %82, %cst_14 {dimension_numbers = #tpu.dot_dimension_numbers<[1], [0], [0], [1], [0, 0, 1, 1], [], []>} : vector<16x4xf32>, vector<4x32xf32>, vector<16x32xf32> -> vector<16x32xf32>
    %84 = arith.addf %78, %83 : vector<16x32xf32>
    %85 = vector.extract_strided_slice %73 {offsets = [2, 0, 0], sizes = [1, 16, 4], strides = [1, 1, 1]} : vector<8x16x4xf32> to vector<1x16x4xf32>
    %86 = vector.shape_cast %85 : vector<1x16x4xf32> to vector<16x4xf32>
    %c2 = arith.constant 2 : index
    %c0_15 = arith.constant 0 : index
    %c0_16 = arith.constant 0 : index
    %87 = vector.load %arg3[%c2, %c0_15, %c0_16] : memref<8x4x32xf32, #tpu.memory_space<vmem>>, vector<1x4x32xf32>
    %88 = vector.shape_cast %87 : vector<1x4x32xf32> to vector<4x32xf32>
    %cst_17 = arith.constant dense<0.000000e+00> : vector<16x32xf32>
    %89 = tpu.matmul %86, %88, %cst_17 {dimension_numbers = #tpu.dot_dimension_numbers<[1], [0], [0], [1], [0, 0, 1, 1], [], []>} : vector<16x4xf32>, vector<4x32xf32>, vector<16x32xf32> -> vector<16x32xf32>
    %90 = arith.addf %84, %89 : vector<16x32xf32>
    %91 = vector.extract_strided_slice %73 {offsets = [3, 0, 0], sizes = [1, 16, 4], strides = [1, 1, 1]} : vector<8x16x4xf32> to vector<1x16x4xf32>
    %92 = vector.shape_cast %91 : vector<1x16x4xf32> to vector<16x4xf32>
    %c3 = arith.constant 3 : index
    %c0_18 = arith.constant 0 : index
    %c0_19 = arith.constant 0 : index
    %93 = vector.load %arg3[%c3, %c0_18, %c0_19] : memref<8x4x32xf32, #tpu.memory_space<vmem>>, vector<1x4x32xf32>
    %94 = vector.shape_cast %93 : vector<1x4x32xf32> to vector<4x32xf32>
    %cst_20 = arith.constant dense<0.000000e+00> : vector<16x32xf32>
    %95 = tpu.matmul %92, %94, %cst_20 {dimension_numbers = #tpu.dot_dimension_numbers<[1], [0], [0], [1], [0, 0, 1, 1], [], []>} : vector<16x4xf32>, vector<4x32xf32>, vector<16x32xf32> -> vector<16x32xf32>
    %96 = arith.addf %90, %95 : vector<16x32xf32>
    %97 = vector.extract_strided_slice %73 {offsets = [4, 0, 0], sizes = [1, 16, 4], strides = [1, 1, 1]} : vector<8x16x4xf32> to vector<1x16x4xf32>
    %98 = vector.shape_cast %97 : vector<1x16x4xf32> to vector<16x4xf32>
    %c4 = arith.constant 4 : index
    %c0_21 = arith.constant 0 : index
    %c0_22 = arith.constant 0 : index
    %99 = vector.load %arg3[%c4, %c0_21, %c0_22] : memref<8x4x32xf32, #tpu.memory_space<vmem>>, vector<1x4x32xf32>
    %100 = vector.shape_cast %99 : vector<1x4x32xf32> to vector<4x32xf32>
    %cst_23 = arith.constant dense<0.000000e+00> : vector<16x32xf32>
    %101 = tpu.matmul %98, %100, %cst_23 {dimension_numbers = #tpu.dot_dimension_numbers<[1], [0], [0], [1], [0, 0, 1, 1], [], []>} : vector<16x4xf32>, vector<4x32xf32>, vector<16x32xf32> -> vector<16x32xf32>
    %102 = arith.addf %96, %101 : vector<16x32xf32>
    %103 = vector.extract_strided_slice %73 {offsets = [5, 0, 0], sizes = [1, 16, 4], strides = [1, 1, 1]} : vector<8x16x4xf32> to vector<1x16x4xf32>
    %104 = vector.shape_cast %103 : vector<1x16x4xf32> to vector<16x4xf32>
    %c5 = arith.constant 5 : index
    %c0_24 = arith.constant 0 : index
    %c0_25 = arith.constant 0 : index
    %105 = vector.load %arg3[%c5, %c0_24, %c0_25] : memref<8x4x32xf32, #tpu.memory_space<vmem>>, vector<1x4x32xf32>
    %106 = vector.shape_cast %105 : vector<1x4x32xf32> to vector<4x32xf32>
    %cst_26 = arith.constant dense<0.000000e+00> : vector<16x32xf32>
    %107 = tpu.matmul %104, %106, %cst_26 {dimension_numbers = #tpu.dot_dimension_numbers<[1], [0], [0], [1], [0, 0, 1, 1], [], []>} : vector<16x4xf32>, vector<4x32xf32>, vector<16x32xf32> -> vector<16x32xf32>
    %108 = arith.addf %102, %107 : vector<16x32xf32>
    %109 = vector.extract_strided_slice %73 {offsets = [6, 0, 0], sizes = [1, 16, 4], strides = [1, 1, 1]} : vector<8x16x4xf32> to vector<1x16x4xf32>
    %110 = vector.shape_cast %109 : vector<1x16x4xf32> to vector<16x4xf32>
    %c6 = arith.constant 6 : index
    %c0_27 = arith.constant 0 : index
    %c0_28 = arith.constant 0 : index
    %111 = vector.load %arg3[%c6, %c0_27, %c0_28] : memref<8x4x32xf32, #tpu.memory_space<vmem>>, vector<1x4x32xf32>
    %112 = vector.shape_cast %111 : vector<1x4x32xf32> to vector<4x32xf32>
    %cst_29 = arith.constant dense<0.000000e+00> : vector<16x32xf32>
    %113 = tpu.matmul %110, %112, %cst_29 {dimension_numbers = #tpu.dot_dimension_numbers<[1], [0], [0], [1], [0, 0, 1, 1], [], []>} : vector<16x4xf32>, vector<4x32xf32>, vector<16x32xf32> -> vector<16x32xf32>
    %114 = arith.addf %108, %113 : vector<16x32xf32>
    %115 = vector.extract_strided_slice %73 {offsets = [7, 0, 0], sizes = [1, 16, 4], strides = [1, 1, 1]} : vector<8x16x4xf32> to vector<1x16x4xf32>
    %116 = vector.shape_cast %115 : vector<1x16x4xf32> to vector<16x4xf32>
    %c7 = arith.constant 7 : index
    %c0_30 = arith.constant 0 : index
    %c0_31 = arith.constant 0 : index
    %117 = vector.load %arg3[%c7, %c0_30, %c0_31] : memref<8x4x32xf32, #tpu.memory_space<vmem>>, vector<1x4x32xf32>
    %118 = vector.shape_cast %117 : vector<1x4x32xf32> to vector<4x32xf32>
    %cst_32 = arith.constant dense<0.000000e+00> : vector<16x32xf32>
    %119 = tpu.matmul %116, %118, %cst_32 {dimension_numbers = #tpu.dot_dimension_numbers<[1], [0], [0], [1], [0, 0, 1, 1], [], []>} : vector<16x4xf32>, vector<4x32xf32>, vector<16x32xf32> -> vector<16x32xf32>
    %120 = arith.addf %114, %119 : vector<16x32xf32>
    %c0_33 = arith.constant 0 : index
    %c0_34 = arith.constant 0 : index
    %121 = vector.load %arg4[%c0_33, %c0_34] : memref<1x32xf32, #tpu.memory_space<vmem>>, vector<1x32xf32>
    %122 = vector.broadcast %121 : vector<1x32xf32> to vector<16x32xf32>
    %123 = arith.addf %120, %122 : vector<16x32xf32>
    %124 = vector.shape_cast %123 : vector<16x32xf32> to vector<2x8x32xf32>
    %c0_35 = arith.constant 0 : index
    %c0_36 = arith.constant 0 : index
    %c0_37 = arith.constant 0 : index
    %125 = vector.load %arg5[%c0_35, %c0_36, %c0_37] : memref<2x8x32xf32, #tpu.memory_space<vmem>>, vector<2x8x32xf32>
    tpu.vector_store %arg5[%c0_35, %c0_36, %c0_37], %124 {strides = array<i32>} : memref<2x8x32xf32, #tpu.memory_space<vmem>>, vector<2x8x32xf32>,
    return
  }
  func.func @transform_0(%arg0: i32) -> (i32, i32, i32) {
    %c0_i32 = arith.constant 0 : i32
    %c0_i32_0 = arith.constant 0 : i32
    %c0_i32_1 = arith.constant 0 : i32
    return %arg0, %c0_i32, %c0_i32_0 : i32, i32, i32
  }
  func.func @transform_1(%arg0: i32) -> (i32, i32) {
    %c0_i32 = arith.constant 0 : i32
    %c0_i32_0 = arith.constant 0 : i32
    %c0_i32_1 = arith.constant 0 : i32
    return %c0_i32, %c0_i32_0 : i32, i32
  }
  func.func @transform_2(%arg0: i32) -> (i32, i32, i32) {
    %c0_i32 = arith.constant 0 : i32
    %c0_i32_0 = arith.constant 0 : i32
    %c0_i32_1 = arith.constant 0 : i32
    %c0_i32_2 = arith.constant 0 : i32
    return %c0_i32, %c0_i32_0, %c0_i32_1 : i32, i32, i32
  }
  func.func @transform_3(%arg0: i32) -> (i32, i32) {
    %c0_i32 = arith.constant 0 : i32
    %c0_i32_0 = arith.constant 0 : i32
    %c0_i32_1 = arith.constant 0 : i32
    return %c0_i32, %c0_i32_0 : i32, i32
  }
  func.func @transform_4(%arg0: i32) -> (i32, i32, i32) {
    %c0_i32 = arith.constant 0 : i32
    %c0_i32_0 = arith.constant 0 : i32
    %c0_i32_1 = arith.constant 0 : i32
    return %arg0, %c0_i32, %c0_i32_0 : i32, i32, i32
  }
}

</mosaic_0001>

<bundles_post_ra>
// kernel: tpu_custom_call.1
= control target key start
LH: loop header
LB: loop body
LE: loop exit
PB: predicated region body
PF: predicated region fallthrough
CT: control target
= control target key end

     0   :  { %9 = vsyncpa [#allocation3], 0  ;;  %s4621_s0 = inlined_call_operand.hbm [shape: f32[2,8,32], index: 0, kind: input, shape index: {}]   ;;  %s4622_s1 = inlined_call_operand.hbm [shape: f32[32,96], index: 1, kind: input, shape index: {}]   ;;  %s4623_s2 = inlined_call_operand.hbm [shape: f32[8,4,32], index: 2, kind: input, shape index: {}]   ;;  %s4624_s3 = inlined_call_operand.vmem [shape: f32[1,32], index: 3, kind: input, shape index: {}]   ;;  %s4625_s4 = inlined_call_operand.hbm [shape: f32[2,8,32], index: 4, kind: output, shape index: {}]  }
   0x1   :  { %10 = vsyncpa [#allocation6], 0 }
   0x2   :  { %11 = vsyncpa [#allocation4], 0  ;;  %s4094_s15 = smov [#allocation5]   ;;  %s4095_s17 = smov [#allocation2]  }
   0x3   :  { %s29_s16 = sshll.u32 %s4094_s15, 4  ;;  %s17_s18 = sshll.u32 %s4095_s17, 4  ;;  %s30_s16 = int_to_ptr.vmem [resolvable:$true] %s29_s16  ;;  %s4137_s18 = int_to_ptr.vmem [resolvable:$true] %s17_s18 }
   0x4   :  { %s4000_s21 = scalar_lea.hbm %s4622_s1, 512 }
   0x5   :  { %p4001_p0 = scmp.ne.s32.totalorder %s4622_s1, %s4000_s21  ;;  %p4004_p1 = scmp.lt.u32.totalorder %s4000_s21, %s4622_s1 }
   0x7   :  { %p4006_p2 = pnand %p4004_p1, %p4001_p0 }
   0x9   :  { %4009 = shalt.err (!%p4006_p2)
}
   0xa   :  { %s4010_s26 = scalar_lea.vmem %s30_s16, 512  ;;  %p4015_p4 = scmp.lt.s32.totalorder %s30_s16, %s30_s16 }
   0xb   :  { %p4011_p3 = scmp.ne.s32.totalorder %s30_s16, %s4010_s26  ;;  %p4016_p5 = scmp.lt.s32.totalorder %s4010_s26, %s4010_s26 }
   0xd   :  { %p4017_p6 = por %p4016_p5, %p4015_p4 }
   0xf   :  { %p4018_p7 = pnand %p4017_p6, %p4011_p3 }
  0x11   :  { %4021 = shalt.err (!%p4018_p7)
}
  0x12   :  { %s4096_s27 = smov 128   ;;  %s4097_s28 = smov 8  }
  0x13   :  { %35 = dma.hbm_to_vmem [thread:$0]  %s4622_s1, 512, %s30_s16, [#allocation6], %s4096_s27, %s4096_s27, %s4097_s28  }
  0x14   :  { %s4022_s7 = scalar_lea.hbm %s4621_s0, 256 }
  0x15   :  { %p4023_p8 = scmp.ne.s32.totalorder %s4621_s0, %s4022_s7  ;;  %p4026_p9 = scmp.lt.u32.totalorder %s4022_s7, %s4621_s0 }
  0x17   :  { %p4028_p10 = pnand %p4026_p9, %p4023_p8 }
  0x19   :  { %4031 = shalt.err (!%p4028_p10)
}
  0x1a   :  { %s4032_s12 = scalar_lea.vmem %s4137_s18, 256  ;;  %p4037_p12 = scmp.lt.s32.totalorder %s4137_s18, %s4137_s18 }
  0x1b   :  { %p4033_p11 = scmp.ne.s32.totalorder %s4137_s18, %s4032_s12  ;;  %p4038_p13 = scmp.lt.s32.totalorder %s4032_s12, %s4032_s12 }
  0x1d   :  { %p4039_p0 = por %p4038_p13, %p4037_p12 }
  0x1f   :  { %p4040_p1 = pnand %p4039_p0, %p4033_p11 }
  0x21   :  { %4043 = shalt.err (!%p4040_p1)
}
  0x22   :  { %23 = dma.hbm_to_vmem [thread:$0]  %s4621_s0, 256, %s4137_s18, [#allocation3], %s4096_s27, %s4096_s27, %s4097_s28  }
  0x23   :  { %s4098_s14 = smov [#allocation7]   ;;  %s4044_s19 = scalar_lea.hbm %s4623_s2, 512 }
  0x24   :  { %s41_s15 = sshll.u32 %s4098_s14, 4  ;;  %p4045_p2 = scmp.ne.s32.totalorder %s4623_s2, %s4044_s19  ;;  %s42_s15 = int_to_ptr.vmem [resolvable:$true] %s41_s15 }
  0x25   :  { %p4048_p3 = scmp.lt.u32.totalorder %s4044_s19, %s4623_s2 }
  0x27   :  { %p4050_p4 = pnand %p4048_p3, %p4045_p2 }
  0x29   :  { %4053 = shalt.err (!%p4050_p4)
}
  0x2a   :  { %s4054_s24 = scalar_lea.vmem %s42_s15, 512  ;;  %p4059_p6 = scmp.lt.s32.totalorder %s42_s15, %s42_s15 }
  0x2b   :  { %p4055_p5 = scmp.ne.s32.totalorder %s42_s15, %s4054_s24  ;;  %p4060_p7 = scmp.lt.s32.totalorder %s4054_s24, %s4054_s24 }
  0x2d   :  { %p4061_p8 = por %p4060_p7, %p4059_p6 }
  0x2f   :  { %p4062_p9 = pnand %p4061_p8, %p4055_p5 }
  0x31   :  { %4065 = shalt.err (!%p4062_p9)
}
  0x32   :  { %s4099_s0 = smov 64   ;;  %s4100_s18 = smov 4  }
  0x33   :  { %47 = dma.hbm_to_vmem [thread:$0]  %s4623_s2, 512, %s42_s15, [#allocation6], %s4099_s0, %s4099_s0, %s4100_s18  }
  0x34   :  { %4088 = dma.done.wait [#allocation3], 256  }
  0x35   :  { %4089 = vsyncadd [#allocation3], 4294967040 }
  0x36   :  { %4090 = dma.done.wait [#allocation6], 1024  }
  0x37   :  { %4091 = vsyncadd [#allocation6], 4294966272  ;;  %vm65_vm0 = vcmask 261120   ;;  %v61_v0 = vld [vmem:[#allocation5] sm:$0xff]  ;;  %v62_v1 = vld [vmem:[#allocation5 + $0x8] sm:$0xff]  ;;  %s4101_s2 = smov 120  }
  0x38   :  { %v63_v2 = vld [vmem:[#allocation5 + $0x10] sm:$0xff]  ;;  %v3896_v3 = vpack.c.bf16 %v62_v1, %v61_v0  ;;  %v64_v4 = vld [vmem:[#allocation5 + $0x18] sm:$0xff]  ;;  %s4102_s29 = smov 124   ;;  %v4103_v10 = vmov 0.0   ;;  %s4104_s30 = smov 116   ;;  %vm4105_vm1 = vmmov 0  }
  0x39   :  { %v59_v5 = vld [vmem:[#allocation2] sm:$0xff]  ;;  %v3900_v6 = vpack.c.bf16 %v64_v4, %v63_v2  ;;  %v60_v7 = vld [vmem:[#allocation2 + $0x8] sm:$0xff]  ;;  %3726 = vmatprep.subr.mxu0 %v4103_v10  ;;  %3728 = vmatprep.mubr.msk.f32.mxu0 %vm4105_vm1, %v4103_v10  ;;  %s4106_s5 = smov 112   ;;  %s4107_s6 = smov 108   ;;  %vm179_vm2 = vcmask 31744   ;;  %vm1394_vm3 = vcmask 64512  }
  0x3a   :  { %3693 = vmatprep.mubr.msk.f32.mxu1 %vm65_vm0, %v59_v5  ;;  %3897 = vmatprep.subr.bf16.mxu1 %v3896_v3  ;;  %s4108_s7 = smov 104   ;;  %s4109_s8 = smov 96   ;;  %vm2796_vm4 = vcmask 1043456  }
  0x3b   :  { %3899 = vmatpush3.bf16.msra.mxu1 %v3896_v3  ;;  %s4110_s9 = smov 100   ;;  %s4111_s12 = smov [#allocation8]  }
  0x3c   :  { %3901 = vmatprep.subr.bf16.mxu1 %v3900_v6  ;;  %s3503_s1 = sshll.u32 %s4111_s12, 4  ;;  %s3504_s1 = int_to_ptr.vmem [resolvable:$true] %s3503_s1 }
  0x3d   :  { %s4066_s13 = scalar_lea.vmem %s3504_s1, 256  ;;  %p4071_p11 = scmp.lt.s32.totalorder %s3504_s1, %s3504_s1 }
  0x3e   :  { %p4067_p10 = scmp.ne.s32.totalorder %s3504_s1, %s4066_s13  ;;  %p4072_p12 = scmp.lt.s32.totalorder %s4066_s13, %s4066_s13 }
  0x3f   :  { %3903 = vmatpush3.bf16.msra.mxu1 %v3900_v6 }
  0x40   :  { %3696 = vmatprep.subr.mxu1 %v4103_v10  ;;  %p4073_p13 = por %p4072_p12, %p4071_p11 }
  0x42   :  { %3694 = vmatmul.mubr.msk.f32.vlgmr.msra.gmra.mrb[0].mxu1 %vm65_vm0, %v60_v7  ;;  %p4074_p0 = pnand %p4073_p13, %p4067_p10 }
  0x43   :  { %3698 = vmatprep.mubr.msk.f32.mxu1 %vm4105_vm1, %v4103_v10 }
 0x115   :  { %v4190_v8 = vpop.f32.mrb[0].mxu1 }
 0x116   :  { %v4192_v9 = vpop.f32.mrb[1].mxu1 }
 0x117   :  { %153 = vrot.lane.b32.xlu1 %v4192_v9, %s4101_s2  ;;  %149 = vrot.lane.b32.xlu0 %v4192_v9, %s4102_s29 }
 0x11b   :  { %155 = vrot.lane.b32.xlu1 %v4190_v8, %s4101_s2  ;;  %151 = vrot.lane.b32.xlu0 %v4190_v8, %s4102_s29 }
 0x11f   :  { %159 = vrot.lane.b32.xlu1 %v4190_v8, %s4104_s30  ;;  %157 = vrot.lane.b32.xlu0 %v4192_v9, %s4104_s30 }
 0x123   :  { %163 = vrot.lane.b32.xlu1 %v4190_v8, %s4106_s5  ;;  %161 = vrot.lane.b32.xlu0 %v4192_v9, %s4106_s5 }
 0x127   :  { %167 = vrot.lane.b32.xlu1 %v4190_v8, %s4107_s6  ;;  %165 = vrot.lane.b32.xlu0 %v4192_v9, %s4107_s6 }
 0x12b   :  { %169 = vrot.lane.b32.xlu1 %v4192_v9, %s4108_s7  ;;  %177 = vrot.lane.b32.xlu0 %v4192_v9, %s4109_s8 }
 0x12f   :  { %254 = vrot.lane.b32.xlu1 %v4190_v8, %s4109_s8  ;;  %171 = vrot.lane.b32.xlu0 %v4190_v8, %s4108_s7 }
 0x133   :  { %173 = vrot.lane.b32.xlu1 %v4192_v9, %s4110_s9 }
 0x189   :  { %v4217_v11 = vpop.permute.xlu1 %153  ;;  %v150_v12 = vpop.permute.xlu0 %149 }
 0x18a   :  { %330 = vrot.lane.b32.xlu0 %v150_v12, %s4109_s8 }
 0x18d   :  { %v4220_v13 = vpop.permute.xlu1 %155  ;;  %v152_v14 = vpop.permute.xlu0 %151 }
 0x18e   :  { %175 = vrot.lane.b32.xlu0 %v4190_v8, %s4110_s9  ;;  %406 = vrot.lane.b32.xlu1 %v152_v14, %s4109_s8 }
 0x191   :  { %v4224_v15 = vpop.permute.xlu1 %159  ;;  %v4226_v16 = vpop.permute.xlu0 %157 }
 0x192   :  { %482 = vrot.lane.b32.xlu0 %v4217_v11, %s4109_s8  ;;  %558 = vrot.lane.b32.xlu1 %v4220_v13, %s4109_s8 }
 0x195   :  { %v4232_v17 = vpop.permute.xlu1 %163  ;;  %v4234_v18 = vpop.permute.xlu0 %161 }
 0x196   :  { %710 = vrot.lane.b32.xlu1 %v4224_v15, %s4109_s8  ;;  %634 = vrot.lane.b32.xlu0 %v4226_v16, %s4109_s8 }
 0x199   :  { %v4240_v19 = vpop.permute.xlu1 %167  ;;  %v4242_v20 = vpop.permute.xlu0 %165 }
 0x19a   :  { %862 = vrot.lane.b32.xlu1 %v4232_v17, %s4109_s8  ;;  %786 = vrot.lane.b32.xlu0 %v4234_v18, %s4109_s8 }
 0x19d   :  { %v4248_v21 = vpop.permute.xlu1 %169  ;;  %v178_v22 = vpop.permute.xlu0 %177 }
 0x19e   :  { %1014 = vrot.lane.b32.xlu1 %v4240_v19, %s4109_s8  ;;  %938 = vrot.lane.b32.xlu0 %v4242_v20, %s4109_s8 }
 0x19f   :  { %3697 = vmatpush3.xpose.msk.msra.mxu1 %vm179_vm2, %v178_v22 }
 0x1a0   :  { %3701 = vmatprep.subr.mxu1 %v4103_v10 }
 0x1a1   :  { %v255_v23 = vpop.permute.xlu1 %254  ;;  %v4256_v24 = vpop.permute.xlu0 %171 }
 0x1a2   :  { %3699 = vmatmul.mubr.msk.f32.vlgmr.msra.gmra.mrb[2].mxu1 %vm179_vm2, %v4192_v9  ;;  %1090 = vrot.lane.b32.xlu0 %v4248_v21, %s4109_s8 }
 0x1a3   :  { %3702 = vmatpush3.xpose.msk.msra.mxu1 %vm179_vm2, %v255_v23  ;;  %1166 = vrot.lane.b32.xlu1 %v4256_v24, %s4109_s8 }
 0x1a4   :  { %3703 = vmatprep.mubr.msk.f32.mxu1 %vm4105_vm1, %v4103_v10  ;;  %3706 = vmatprep.subr.mxu1 %v4103_v10 }
 0x1a5   :  { %v4268_v25 = vpop.permute.xlu1 %173 }
 0x1a6   :  { %3704 = vmatmul.mubr.msk.f32.vlgmr.msra.gmra.mrb[4].mxu1 %vm179_vm2, %v4190_v8  ;;  %1242 = vrot.lane.b32.xlu0 %v4268_v25, %s4109_s8 }
 0x1a7   :  { %3708 = vmatprep.mubr.msk.f32.mxu1 %vm4105_vm1, %v4103_v10 }
 0x1aa   :  { %1539 = vrot.lane.b32.xlu0 %v4192_v9, %s4099_s0 }
 0x1ae   :  { %1919 = vrot.lane.b32.xlu0 %v4220_v13, %s4099_s0 }
 0x1b2   :  { %2071 = vrot.lane.b32.xlu0 %v4224_v15, %s4099_s0 }
 0x1b6   :  { %2223 = vrot.lane.b32.xlu0 %v4232_v17, %s4099_s0 }
 0x1ba   :  { %1691 = vrot.lane.b32.xlu0 %v150_v12, %s4099_s0 }
 0x1fc   :  { %v331_v26 = vpop.permute.xlu0 %330 }
 0x1fd   :  { %3707 = vmatpush3.xpose.msk.msra.mxu1 %vm179_vm2, %v331_v26 }
 0x1fe   :  { %3711 = vmatprep.subr.mxu1 %v4103_v10 }
 0x200   :  { %v407_v27 = vpop.permute.xlu1 %406  ;;  %3709 = vmatmul.mubr.msk.f32.vlgmr.msra.gmra.mrb[6].mxu1 %vm179_vm2, %v150_v12  ;;  %v4288_v28 = vpop.permute.xlu0 %175 }
 0x201   :  { %3712 = vmatpush3.xpose.msk.msra.mxu1 %vm179_vm2, %v407_v27  ;;  %1318 = vrot.lane.b32.xlu1 %v4288_v28, %s4109_s8 }
 0x202   :  { %3713 = vmatprep.mubr.msk.f32.mxu1 %vm4105_vm1, %v4103_v10  ;;  %3716 = vmatprep.subr.mxu1 %v4103_v10 }
 0x204   :  { %v559_v29 = vpop.permute.xlu1 %558  ;;  %3714 = vmatmul.mubr.msk.f32.vlgmr.msra.gmra.mrb[8].mxu1 %vm179_vm2, %v152_v14  ;;  %v483_v30 = vpop.permute.xlu0 %482 }
 0x205   :  { %1615 = vrot.lane.b32.xlu1 %v4190_v8, %s4099_s0  ;;  %3717 = vmatpush3.xpose.msk.msra.mxu1 %vm179_vm2, %v483_v30 }
 0x206   :  { %3718 = vmatprep.mubr.msk.f32.mxu1 %vm4105_vm1, %v4103_v10  ;;  %3721 = vmatprep.subr.mxu1 %v4103_v10 }
 0x208   :  { %v711_v31 = vpop.permute.xlu1 %710  ;;  %3719 = vmatmul.mubr.msk.f32.vlgmr.msra.gmra.mrb[10].mxu1 %vm179_vm2, %v4217_v11  ;;  %v635_v32 = vpop.permute.xlu0 %634 }
 0x209   :  { %1767 = vrot.lane.b32.xlu1 %v152_v14, %s4099_s0  ;;  %3722 = vmatpush3.xpose.msk.msra.mxu1 %vm179_vm2, %v559_v29 }
 0x20a   :  { %3727 = vmatpush3.xpose.msk.msra.mxu0 %vm179_vm2, %v635_v32  ;;  %3723 = vmatprep.mubr.msk.f32.mxu1 %vm4105_vm1, %v4103_v10 }
 0x20b   :  { %3731 = vmatprep.subr.mxu1 %v4103_v10  ;;  %3736 = vmatprep.subr.mxu0 %v4103_v10 }
 0x20c   :  { %3724 = vmatmul.mubr.msk.f32.vlgmr.msra.gmra.mrb[12].mxu1 %vm179_vm2, %v4220_v13  ;;  %v787_v33 = vpop.permute.xlu0 %786  ;;  %v863_v34 = vpop.permute.xlu1 %862 }
 0x20d   :  { %3729 = vmatmul.mubr.msk.f32.vlgmr.msra.gmra.mrb[0].mxu0 %vm179_vm2, %v4226_v16  ;;  %1843 = vrot.lane.b32.xlu1 %v4217_v11, %s4099_s0 }
 0x20e   :  { %3732 = vmatpush3.xpose.msk.msra.mxu1 %vm179_vm2, %v711_v31  ;;  %3737 = vmatpush3.xpose.msk.msra.mxu0 %vm179_vm2, %v787_v33 }
 0x20f   :  { %3733 = vmatprep.mubr.msk.f32.mxu1 %vm4105_vm1, %v4103_v10  ;;  %3738 = vmatprep.mubr.msk.f32.mxu0 %vm4105_vm1, %v4103_v10 }
 0x210   :  { %3741 = vmatprep.subr.mxu1 %v4103_v10  ;;  %3746 = vmatprep.subr.mxu0 %v4103_v10  ;;  %v939_v35 = vpop.permute.xlu0 %938  ;;  %v1015_v36 = vpop.permute.xlu1 %1014 }
 0x211   :  { %3734 = vmatmul.mubr.msk.f32.vlgmr.msra.gmra.mrb[14].mxu1 %vm179_vm2, %v4224_v15  ;;  %3739 = vmatmul.mubr.msk.f32.vlgmr.msra.gmra.mrb[2].mxu0 %vm179_vm2, %v4234_v18 }
 0x212   :  { %1995 = vrot.lane.b32.xlu1 %v4226_v16, %s4099_s0  ;;  %3742 = vmatpush3.xpose.msk.msra.mxu1 %vm179_vm2, %v863_v34 }
 0x213   :  { %3747 = vmatpush3.xpose.msk.msra.mxu0 %vm179_vm2, %v939_v35  ;;  %3743 = vmatprep.mubr.msk.f32.mxu1 %vm4105_vm1, %v4103_v10 }
 0x214   :  { %3748 = vmatprep.mubr.msk.f32.mxu0 %vm4105_vm1, %v4103_v10  ;;  %3751 = vmatprep.subr.mxu1 %v4103_v10  ;;  %v1091_v37 = vpop.permute.xlu0 %1090 }
 0x215   :  { %3744 = vmatmul.mubr.msk.f32.vlgmr.msra.gmra.mrb[16].mxu1 %vm179_vm2, %v4232_v17  ;;  %3756 = vmatprep.subr.mxu0 %v4103_v10  ;;  %v1167_v39 = vpop.permute.xlu1 %1166 }
 0x216   :  { %3749 = vmatmul.mubr.msk.f32.vlgmr.msra.gmra.mrb[4].mxu0 %vm179_vm2, %v4242_v20  ;;  %2147 = vrot.lane.b32.xlu1 %v4234_v18, %s4099_s0 }
 0x217   :  { %3752 = vmatpush3.xpose.msk.msra.mxu1 %vm179_vm2, %v1015_v36  ;;  %3757 = vmatpush3.xpose.msk.msra.mxu0 %vm179_vm2, %v1091_v37 }
 0x218   :  { %3753 = vmatprep.mubr.msk.f32.mxu1 %vm4105_vm1, %v4103_v10  ;;  %3758 = vmatprep.mubr.msk.f32.mxu0 %vm4105_vm1, %v4103_v10  ;;  %v1243_v38 = vpop.permute.xlu0 %1242 }
 0x219   :  { %3761 = vmatprep.subr.mxu1 %v4103_v10  ;;  %3766 = vmatprep.subr.mxu0 %v4103_v10 }
 0x21a   :  { %3754 = vmatmul.mubr.msk.f32.vlgmr.msra.gmra.mrb[18].mxu1 %vm179_vm2, %v4240_v19  ;;  %3759 = vmatmul.mubr.msk.f32.vlgmr.msra.gmra.mrb[6].mxu0 %vm179_vm2, %v4248_v21 }
 0x21b   :  { %3762 = vmatpush3.xpose.msk.msra.mxu1 %vm179_vm2, %v1167_v39  ;;  %3767 = vmatpush3.xpose.msk.msra.mxu0 %vm179_vm2, %v1243_v38 }
 0x21c   :  { %3763 = vmatprep.mubr.msk.f32.mxu1 %vm4105_vm1, %v4103_v10  ;;  %3768 = vmatprep.mubr.msk.f32.mxu0 %vm4105_vm1, %v4103_v10  ;;  %v1540_v40 = vpop.permute.xlu0 %1539 }
 0x21d   :  { %3776 = vmatprep.subr.mxu0 %v4103_v10  ;;  %3771 = vmatprep.subr.mxu1 %v4103_v10 }
 0x21e   :  { %3764 = vmatmul.mubr.msk.f32.vlgmr.msra.gmra.mrb[20].mxu1 %vm179_vm2, %v4256_v24  ;;  %3769 = vmatmul.mubr.msk.f32.vlgmr.msra.gmra.mrb[8].mxu0 %vm179_vm2, %v4268_v25 }
 0x21f   :  { %3777 = vmatpush3.msra.mxu0 %v1540_v40  ;;  %3773 = vmatprep.mubr.msk.f32.mxu1 %vm4105_vm1, %v4103_v10 }
 0x220   :  { %3778 = vmatprep.mubr.msk.f32.mxu0 %vm4105_vm1, %v4103_v10  ;;  %3786 = vmatprep.subr.mxu0 %v4103_v10  ;;  %v4420_v9 = vpop.permute.xlu0 %1919 }
 0x224   :  { %v4434_v27 = vpop.permute.xlu0 %2071 }
 0x228   :  { %v4438_v30 = vpop.permute.xlu0 %2223 }
 0x22c   :  { %v1692_v32 = vpop.permute.xlu0 %1691 }
 0x273   :  { %v1319_v41 = vpop.permute.xlu1 %1318 }
 0x274   :  { %3772 = vmatpush3.xpose.msk.msra.mxu1 %vm179_vm2, %v1319_v41 }
 0x275   :  { %v4376_v42 = vpop.f32.mrb[2].mxu1  ;;  %3781 = vmatprep.subr.mxu1 %v4103_v10 }
 0x276   :  { %v3700_v43 = vpop.f32.mrb[3].mxu1  ;;  %v1395_v44 = vsel %vm1394_vm3, %v4376_v42, -inf }
 0x277   :  { %1396 = vmax.xlane.f32.xlu0 %v1395_v44  ;;  %v1616_v45 = vpop.permute.xlu1 %1615  ;;  %3774 = vmatmul.mubr.msk.f32.vlgmr.msra.gmra.mrb[22].mxu1 %vm179_vm2, %v4288_v28 }
 0x278   :  { %3782 = vmatpush3.msra.mxu1 %v1616_v45  ;;  %3783 = vmatprep.mubr.msk.f32.mxu1 %vm4105_vm1, %v4103_v10 }
 0x279   :  { %v4385_v46 = vpop.f32.mrb[4].mxu1  ;;  %3791 = vmatprep.subr.mxu1 %v4103_v10 }
 0x27a   :  { %v3705_v47 = vpop.f32.mrb[5].mxu1  ;;  %v1398_v48 = vsel %vm1394_vm3, %v4385_v46, -inf }
 0x27b   :  { %1399 = vmax.xlane.f32.xlu1 %v1398_v48  ;;  %v1768_v16 = vpop.permute.xlu1 %1767 }
 0x27f   :  { %v1844_v29 = vpop.permute.xlu1 %1843 }
 0x284   :  { %v4440_v31 = vpop.permute.xlu1 %1995 }
 0x288   :  { %v4442_v33 = vpop.permute.xlu1 %2147 }
 0x2d3   :  { %v4390_v49 = vpop.f32.mrb[6].mxu1 }
 0x2d4   :  { %v3710_v50 = vpop.f32.mrb[7].mxu1  ;;  %v1401_v51 = vsel %vm1394_vm3, %v4390_v49, -inf }
 0x2d5   :  { %1402 = vmax.xlane.f32.xlu0 %v1401_v51 }
 0x2d7   :  { %v4394_v52 = vpop.f32.mrb[8].mxu1 }
 0x2d8   :  { %v3715_v53 = vpop.f32.mrb[9].mxu1  ;;  %v1404_v54 = vsel %vm1394_vm3, %v4394_v52, -inf }
 0x2d9   :  { %1405 = vmax.xlane.f32.xlu0 %v1404_v54 }
 0x2db   :  { %v4398_v55 = vpop.f32.mrb[10].mxu1 }
 0x2dc   :  { %v3720_v56 = vpop.f32.mrb[11].mxu1  ;;  %v1407_v2 = vsel %vm1394_vm3, %v4398_v55, -inf }
 0x2df   :  { %v4400_v57 = vpop.f32.mrb[12].mxu1 }
 0x2e0   :  { %v4402_v58 = vpop.f32.mrb[0].mxu0  ;;  %v3725_v59 = vpop.f32.mrb[13].mxu1  ;;  %v1410_v15 = vsel %vm1394_vm3, %v4400_v57, -inf }
 0x2e1   :  { %v3730_v60 = vpop.f32.mrb[1].mxu0  ;;  %v1413_v61 = vsel %vm1394_vm3, %v4402_v58, -inf }
 0x2e2   :  { %1414 = vmax.xlane.f32.xlu1 %v1413_v61 }
 0x2e4   :  { %v4406_v62 = vpop.f32.mrb[14].mxu1  ;;  %v4408_v63 = vpop.f32.mrb[2].mxu0 }
 0x2e5   :  { %v3735_v0 = vpop.f32.mrb[15].mxu1  ;;  %v3740_v1 = vpop.f32.mrb[3].mxu0  ;;  %v1419_v3 = vsel %vm1394_vm3, %v4408_v63, -inf  ;;  %v1416_v41 = vsel %vm1394_vm3, %v4406_v62, -inf }
 0x2e6   :  { %1408 = vmax.xlane.f32.xlu1 %v1407_v2  ;;  %1420 = vmax.xlane.f32.xlu0 %v1419_v3 }
 0x2e8   :  { %v4414_v4 = vpop.f32.mrb[16].mxu1 }
 0x2e9   :  { %v4416_v5 = vpop.f32.mrb[4].mxu0  ;;  %v3745_v6 = vpop.f32.mrb[17].mxu1  ;;  %v1422_v43 = vsel %vm1394_vm3, %v4414_v4, -inf }
 0x2ea   :  { %v3750_v7 = vpop.f32.mrb[5].mxu0  ;;  %v1425_v8 = vsel %vm1394_vm3, %v4416_v5, -inf }
 0x2eb   :  { %1426 = vmax.xlane.f32.xlu0 %v1425_v8 }
 0x2ed   :  { %v4422_v11 = vpop.f32.mrb[18].mxu1  ;;  %v4424_v12 = vpop.f32.mrb[6].mxu0 }
 0x2ee   :  { %v3755_v13 = vpop.f32.mrb[19].mxu1  ;;  %v3760_v14 = vpop.f32.mrb[7].mxu0  ;;  %v1428_v26 = vsel %vm1394_vm3, %v4422_v11, -inf }
 0x2ef   :  { %1411 = vmax.xlane.f32.xlu0 %v1410_v15 }
 0x2f1   :  { %v4428_v17 = vpop.f32.mrb[20].mxu1  ;;  %v4430_v18 = vpop.f32.mrb[8].mxu0 }
 0x2f2   :  { %v3765_v22 = vpop.f32.mrb[21].mxu1  ;;  %v3770_v23 = vpop.f32.mrb[9].mxu0  ;;  %v1434_v44 = vsel %vm1394_vm3, %v4428_v17, -inf }
 0x2f3   :  { %1429 = vmax.xlane.f32.xlu0 %v1428_v26 }
 0x2f7   :  { %2299 = vrot.lane.b32.xlu1 %v4242_v20, %s4099_s0 }
 0x304   :  { %v1397_v34 = vpop.xlane.xlu0 %1396 }
 0x305   :  { %v1443_v35 = vsub.f32 %v4376_v42, %v1397_v34  ;;  %v1437_v42 = vsel %vm1394_vm3, %v4430_v18, -inf }
 0x307   :  { %v1459_v36 = vmul.f32 1.442695, %v1443_v35 }
 0x308   :  { %v1400_v37 = vpop.xlane.xlu1 %1399 }
 0x309   :  { %3936 = vpow2.f32 %v1459_v36  ;;  %v1444_v38 = vsub.f32 %v4385_v46, %v1400_v37  ;;  %2451 = vrot.lane.b32.xlu0 %v4248_v21, %s4099_s0  ;;  %v1431_v21 = vsel %vm1394_vm3, %v4424_v12, -inf }
 0x30b   :  { %v1461_v20 = vmul.f32 1.442695, %v1444_v38 }
 0x30d   :  { %3938 = vpow2.f32 %v1461_v20 }
 0x313   :  { %v4448_v39 = vpop.eup %3936 }
 0x314   :  { %3779 = vmatmul.mubr.msk.f32.vlgmr.msra.gmra.mrb[10].mxu0 %vm1394_vm3, %v4448_v39 }
 0x315   :  { %3787 = vmatpush3.msra.mxu0 %v1692_v32  ;;  %3788 = vmatprep.mubr.msk.f32.mxu0 %vm4105_vm1, %v4103_v10 }
 0x316   :  { %3796 = vmatprep.subr.mxu0 %v4103_v10 }
 0x317   :  { %v4455_v40 = vpop.eup %3938 }
 0x318   :  { %3784 = vmatmul.mubr.msk.f32.vlgmr.msra.gmra.mrb[24].mxu1 %vm1394_vm3, %v4455_v40  ;;  %v1494_v22 = vsel %vm1394_vm3, %v4455_v40, 0.0 }
 0x319   :  { %3792 = vmatpush3.msra.mxu1 %v1768_v16  ;;  %3793 = vmatprep.mubr.msk.f32.mxu1 %vm4105_vm1, %v4103_v10 }
 0x31a   :  { %3801 = vmatprep.subr.mxu1 %v4103_v10 }
 0x31b   :  { %1432 = vmax.xlane.f32.xlu1 %v1431_v21 }
 0x31f   :  { %1417 = vmax.xlane.f32.xlu1 %v1416_v41 }
 0x323   :  { %1438 = vmax.xlane.f32.xlu1 %v1437_v42 }
 0x327   :  { %1423 = vmax.xlane.f32.xlu1 %v1422_v43 }
 0x328   :  { %1435 = vmax.xlane.f32.xlu0 %v1434_v44 }
 0x338   :  { %2375 = vrot.lane.b32.xlu1 %v4240_v19, %s4099_s0 }
 0x33c   :  { %2527 = vrot.lane.b32.xlu1 %v4256_v24, %s4099_s0 }
 0x340   :  { %2679 = vrot.lane.b32.xlu1 %v4288_v28, %s4099_s0 }
 0x34a   :  { %v4478_v45 = vpop.f32.mrb[22].mxu1 }
 0x34b   :  { %v3775_v46 = vpop.f32.mrb[23].mxu1  ;;  %v1440_v47 = vsel %vm1394_vm3, %v4478_v45, -inf }
 0x34c   :  { %1441 = vmax.xlane.f32.xlu0 %v1440_v47 }
 0x362   :  { %2603 = vrot.lane.b32.xlu0 %v4268_v25, %s4099_s0  ;;  %v1403_v48 = vpop.xlane.xlu0 %1402 }
 0x363   :  { %v1445_v50 = vsub.f32 %v4390_v49, %v1403_v48 }
 0x365   :  { %v1463_v19 = vmul.f32 1.442695, %v1445_v50 }
 0x366   :  { %v1406_v51 = vpop.xlane.xlu0 %1405 }
 0x367   :  { %3940 = vpow2.f32 %v1463_v19  ;;  %v1446_v24 = vsub.f32 %v4394_v52, %v1406_v51 }
 0x369   :  { %v1465_v53 = vmul.f32 1.442695, %v1446_v24 }
 0x36b   :  { %3942 = vpow2.f32 %v1465_v53 }
 0x36f   :  { %v1415_v28 = vpop.xlane.xlu1 %1414 }
 0x370   :  { %v1449_v56 = vsub.f32 %v4402_v58, %v1415_v28 }
 0x371   :  { %v3941_v54 = vpop.eup %3940 }
 0x372   :  { %3789 = vmatmul.mubr.msk.f32.vlgmr.msra.gmra.mrb[12].mxu0 %vm1394_vm3, %v3941_v54  ;;  %v1471_v52 = vmul.f32 1.442695, %v1449_v56  ;;  %v1497_v8 = vsel %vm1394_vm3, %v3941_v54, 0.0 }
 0x373   :  { %v1409_v59 = vpop.xlane.xlu1 %1408  ;;  %3797 = vmatpush3.msra.mxu0 %v1844_v29  ;;  %v1421_v60 = vpop.xlane.xlu0 %1420  ;;  %3798 = vmatprep.mubr.msk.f32.mxu0 %vm4105_vm1, %v4103_v10 }
 0x374   :  { %v1447_v25 = vsub.f32 %v4398_v55, %v1409_v59  ;;  %3806 = vmatprep.subr.mxu0 %v4103_v10  ;;  %v1451_v58 = vsub.f32 %v4408_v63, %v1421_v60 }
 0x375   :  { %v3943_v49 = vpop.eup %3942 }
 0x376   :  { %v1467_v61 = vmul.f32 1.442695, %v1447_v25  ;;  %3794 = vmatmul.mubr.msk.f32.vlgmr.msra.gmra.mrb[26].mxu1 %vm1394_vm3, %v3943_v49  ;;  %v1500_v0 = vsel %vm1394_vm3, %v3943_v49, 0.0  ;;  %v1475_v55 = vmul.f32 1.442695, %v1451_v58 }
 0x377   :  { %3802 = vmatpush3.msra.mxu1 %v4420_v9  ;;  %1501 = vadd.xlane.f32.xlu1 %v1500_v0  ;;  %v2300_v26 = vpop.permute.xlu1 %2299  ;;  %v2787_v0 = vld [vmem:[#allocation7] sm:$0xf] }
 0x378   :  { %3944 = vpow2.f32 %v1467_v61  ;;  %v1427_v1 = vpop.xlane.xlu0 %1426  ;;  %3803 = vmatprep.mubr.msk.f32.mxu1 %vm4105_vm1, %v4103_v10  ;;  %3811 = vmatprep.subr.mxu1 %v4103_v10 }
 0x379   :  { %3946 = vpow2.f32 %v1471_v52  ;;  %v1453_v2 = vsub.f32 %v4416_v5, %v1427_v1  ;;  %v2789_v52 = vld [vmem:[#allocation7 + $0x4] sm:$0xf] }
 0x37a   :  { %3948 = vpow2.f32 %v1475_v55 }
 0x37b   :  { %v1479_v7 = vmul.f32 1.442695, %v1453_v2 }
 0x37c   :  { %v1412_v3 = vpop.xlane.xlu0 %1411 }
 0x37d   :  { %v1448_v6 = vsub.f32 %v4400_v57, %v1412_v3  ;;  %v1491_v57 = vsel %vm1394_vm3, %v4448_v39, 0.0 }
 0x37f   :  { %v1469_v63 = vmul.f32 1.442695, %v1448_v6 }
 0x380   :  { %v1430_v16 = vpop.xlane.xlu0 %1429 }
 0x381   :  { %3950 = vpow2.f32 %v1469_v63  ;;  %1498 = vadd.xlane.f32.xlu0 %v1497_v8  ;;  %v1454_v21 = vsub.f32 %v4422_v11, %v1430_v16 }
 0x382   :  { %v3945_v9 = vpop.eup %3944  ;;  %3952 = vpow2.f32 %v1479_v7 }
 0x383   :  { %3799 = vmatmul.mubr.msk.f32.vlgmr.msra.gmra.mrb[14].mxu0 %vm1394_vm3, %v3945_v9  ;;  %v1503_v13 = vsel %vm1394_vm3, %v3945_v9, 0.0  ;;  %v3947_v14 = vpop.eup %3946 }
 0x384   :  { %3807 = vmatpush3.msra.mxu0 %v4440_v31  ;;  %1504 = vadd.xlane.f32.xlu1 %v1503_v13  ;;  %v1509_v5 = vsel %vm1394_vm3, %v3947_v14, 0.0  ;;  %v3949_v15 = vpop.eup %3948 }
 0x385   :  { %3808 = vmatprep.mubr.msk.f32.mxu0 %vm4105_vm1, %v4103_v10  ;;  %3816 = vmatprep.subr.mxu0 %v4103_v10  ;;  %v1515_v29 = vsel %vm1394_vm3, %v3949_v15, 0.0 }
 0x386   :  { %1492 = vadd.xlane.f32.xlu0 %v1491_v57 }
 0x387   :  { %3809 = vmatmul.mubr.msk.f32.vlgmr.msra.gmra.mrb[16].mxu0 %vm1394_vm3, %v3947_v14 }
 0x388   :  { %3817 = vmatpush3.msra.mxu0 %v4442_v33  ;;  %1510 = vadd.xlane.f32.xlu1 %v1509_v5  ;;  %v2452_v33 = vpop.permute.xlu0 %2451 }
 0x389   :  { %3818 = vmatprep.mubr.msk.f32.mxu0 %vm4105_vm1, %v4103_v10  ;;  %3826 = vmatprep.subr.mxu0 %v4103_v10 }
 0x38a   :  { %1495 = vadd.xlane.f32.xlu0 %v1494_v22 }
 0x38b   :  { %v3951_v23 = vpop.eup %3950  ;;  %3819 = vmatmul.mubr.msk.f32.vlgmr.msra.gmra.mrb[18].mxu0 %vm1394_vm3, %v3949_v15 }
 0x38c   :  { %3804 = vmatmul.mubr.msk.f32.vlgmr.msra.gmra.mrb[28].mxu1 %vm1394_vm3, %v3951_v23  ;;  %3827 = vmatpush3.msra.mxu0 %v2300_v26  ;;  %v3953_v31 = vpop.eup %3952  ;;  %v1506_v32 = vsel %vm1394_vm3, %v3951_v23, 0.0 }
 0x38d   :  { %3812 = vmatpush3.msra.mxu1 %v4434_v27  ;;  %1516 = vadd.xlane.f32.xlu1 %v1515_v29  ;;  %v1521_v34 = vsel %vm1394_vm3, %v3953_v31, 0.0  ;;  %v2960_v29 = vld [vmem:[#allocation7 + $0x8] sm:$0xf] }
 0x38e   :  { %3828 = vmatprep.mubr.msk.f32.mxu0 %vm4105_vm1, %v4103_v10  ;;  %3836 = vmatprep.subr.mxu0 %v4103_v10 }
 0x38f   :  { %1507 = vadd.xlane.f32.xlu0 %v1506_v32  ;;  %3829 = vmatmul.mubr.msk.f32.vlgmr.msra.gmra.mrb[20].mxu0 %vm1394_vm3, %v3953_v31 }
 0x390   :  { %3837 = vmatpush3.msra.mxu0 %v2452_v33  ;;  %3838 = vmatprep.mubr.msk.f32.mxu0 %vm4105_vm1, %v4103_v10 }
 0x391   :  { %1522 = vadd.xlane.f32.xlu1 %v1521_v34  ;;  %3813 = vmatprep.mubr.msk.f32.mxu1 %vm4105_vm1, %v4103_v10 }
 0x392   :  { %3821 = vmatprep.subr.mxu1 %v4103_v10  ;;  %3846 = vmatprep.subr.mxu0 %v4103_v10 }
 0x3a8   :  { %v1433_v27 = vpop.xlane.xlu1 %1432 }
 0x3a9   :  { %v1455_v35 = vsub.f32 %v4424_v12, %v1433_v27  ;;  %v1481_v12 = vmul.f32 1.442695, %v1454_v21  ;;  %v3048_v27 = vld [vmem:[#allocation7 + $0xc] sm:$0xf] }
 0x3ab   :  { %v1483_v36 = vmul.f32 1.442695, %v1455_v35 }
 0x3ac   :  { %v1418_v37 = vpop.xlane.xlu1 %1417 }
 0x3ad   :  { %3954 = vpow2.f32 %v1483_v36  ;;  %v1450_v38 = vsub.f32 %v4406_v62, %v1418_v37 }
 0x3af   :  { %v1473_v20 = vmul.f32 1.442695, %v1450_v38 }
 0x3b0   :  { %v1439_v39 = vpop.xlane.xlu1 %1438 }
 0x3b1   :  { %3956 = vpow2.f32 %v1473_v20  ;;  %v1457_v40 = vsub.f32 %v4430_v18, %v1439_v39 }
 0x3b3   :  { %v1487_v41 = vmul.f32 1.442695, %v1457_v40 }
 0x3b4   :  { %v1424_v42 = vpop.xlane.xlu1 %1423 }
 0x3b5   :  { %3958 = vpow2.f32 %v1487_v41  ;;  %v1452_v43 = vsub.f32 %v4414_v4, %v1424_v42  ;;  %v1436_v44 = vpop.xlane.xlu0 %1435 }
 0x3b6   :  { %v1456_v48 = vsub.f32 %v4428_v17, %v1436_v44 }
 0x3b7   :  { %v3955_v46 = vpop.eup %3954  ;;  %v1477_v47 = vmul.f32 1.442695, %v1452_v43 }
 0x3b8   :  { %3839 = vmatmul.mubr.msk.f32.vlgmr.msra.gmra.mrb[22].mxu0 %vm1394_vm3, %v3955_v46  ;;  %v1527_v62 = vsel %vm1394_vm3, %v3955_v46, 0.0  ;;  %v1485_v18 = vmul.f32 1.442695, %v1456_v48  ;;  %v2376_v50 = vpop.permute.xlu1 %2375 }
 0x3b9   :  { %3960 = vpow2.f32 %v1477_v47  ;;  %1528 = vadd.xlane.f32.xlu1 %v1527_v62  ;;  %3848 = vmatprep.mubr.msk.f32.mxu0 %vm4105_vm1, %v4103_v10  ;;  %v3136_v47 = vld [vmem:[#allocation7 + $0x10] sm:$0xf] }
 0x3ba   :  { %3962 = vpow2.f32 %v1481_v12 }
 0x3bb   :  { %v3957_v11 = vpop.eup %3956  ;;  %3964 = vpow2.f32 %v1485_v18 }
 0x3bc   :  { %3814 = vmatmul.mubr.msk.f32.vlgmr.msra.gmra.mrb[30].mxu1 %vm1394_vm3, %v3957_v11  ;;  %v1512_v4 = vsel %vm1394_vm3, %v3957_v11, 0.0 }
 0x3bd   :  { %3822 = vmatpush3.msra.mxu1 %v4438_v30  ;;  %1513 = vadd.xlane.f32.xlu0 %v1512_v4  ;;  %v2528_v30 = vpop.permute.xlu1 %2527 }
 0x3be   :  { %3823 = vmatprep.mubr.msk.f32.mxu1 %vm4105_vm1, %v4103_v10  ;;  %3831 = vmatprep.subr.mxu1 %v4103_v10 }
 0x3bf   :  { %v3959_v17 = vpop.eup %3958 }
 0x3c0   :  { %v1533_v19 = vsel %vm1394_vm3, %v3959_v17, 0.0 }
 0x3c1   :  { %1534 = vadd.xlane.f32.xlu1 %v1533_v19  ;;  %v2680_v56 = vpop.permute.xlu1 %2679 }
 0x3c3   :  { %v3961_v51 = vpop.eup %3960 }
 0x3c4   :  { %3824 = vmatmul.mubr.msk.f32.vlgmr.msra.gmra.mrb[32].mxu1 %vm1394_vm3, %v3961_v51  ;;  %v1518_v24 = vsel %vm1394_vm3, %v3961_v51, 0.0  ;;  %v3963_v53 = vpop.eup %3962 }
 0x3c5   :  { %3832 = vmatpush3.msra.mxu1 %v2376_v50  ;;  %1519 = vadd.xlane.f32.xlu0 %v1518_v24  ;;  %v1524_v28 = vsel %vm1394_vm3, %v3963_v53, 0.0  ;;  %v3965_v54 = vpop.eup %3964 }
 0x3c6   :  { %3833 = vmatprep.mubr.msk.f32.mxu1 %vm4105_vm1, %v4103_v10  ;;  %3841 = vmatprep.subr.mxu1 %v4103_v10  ;;  %v1530_v59 = vsel %vm1394_vm3, %v3965_v54, 0.0 }
 0x3c8   :  { %3834 = vmatmul.mubr.msk.f32.vlgmr.msra.gmra.mrb[34].mxu1 %vm1394_vm3, %v3963_v53 }
 0x3c9   :  { %3842 = vmatpush3.msra.mxu1 %v2528_v30  ;;  %1525 = vadd.xlane.f32.xlu0 %v1524_v28 }
 0x3ca   :  { %3843 = vmatprep.mubr.msk.f32.mxu1 %vm4105_vm1, %v4103_v10  ;;  %3851 = vmatprep.subr.mxu1 %v4103_v10 }
 0x3cc   :  { %3844 = vmatmul.mubr.msk.f32.vlgmr.msra.gmra.mrb[36].mxu1 %vm1394_vm3, %v3965_v54 }
 0x3cd   :  { %3852 = vmatpush3.msra.mxu1 %v2680_v56  ;;  %1531 = vadd.xlane.f32.xlu0 %v1530_v59  ;;  %v3224_v56 = vld [vmem:[#allocation7 + $0x14] sm:$0xf] }
 0x3ce   :  { %3853 = vmatprep.mubr.msk.f32.mxu1 %vm4105_vm1, %v4103_v10 }
 0x3d9   :  { %v1442_v60 = vpop.xlane.xlu0 %1441 }
 0x3da   :  { %v1458_v25 = vsub.f32 %v4478_v45, %v1442_v60 }
 0x3dc   :  { %v1489_v49 = vmul.f32 1.442695, %v1458_v25 }
 0x3dd   :  { %v2604_v61 = vpop.permute.xlu0 %2603 }
 0x3de   :  { %3966 = vpow2.f32 %v1489_v49  ;;  %3847 = vmatpush3.msra.mxu0 %v2604_v61 }
 0x3df   :  { %3849 = vmatmul.mubr.msk.f32.vlgmr.msra.gmra.mrb[24].mxu0 %vm1394_vm3, %v3959_v17  ;;  %3856 = vmatprep.subr.msk.mxu0 %vm2796_vm4, %v2789_v52 }
 0x3e0   :  { %3857 = vmatpush3.msk.msra.mxu0 %vm2796_vm4, %v2789_v52 }
 0x3e1   :  { %3861 = vmatprep.subr.msk.mxu0 %vm2796_vm4, %v2787_v0 }
 0x3e7   :  { %v1611_v58 = vpop.f32.mrb[10].mxu0 }
 0x3e8   :  { %v3967_v10 = vpop.eup %3966  ;;  %v3780_v1 = vpop.f32.mrb[11].mxu0 }
 0x3e9   :  { %3854 = vmatmul.mubr.msk.f32.vlgmr.msra.gmra.mrb[38].mxu1 %vm1394_vm3, %v3967_v10  ;;  %v1536_v45 = vsel %vm1394_vm3, %v3967_v10, 0.0  ;;  %v3312_v10 = vld [vmem:[#allocation7 + $0x18] sm:$0xf] }
 0x3ea   :  { %1537 = vadd.xlane.f32.xlu0 %v1536_v45 }
 0x3eb   :  { %v1687_v55 = vpop.f32.mrb[24].mxu1 }
 0x3ec   :  { %v3785_v2 = vpop.f32.mrb[25].mxu1 }
 0x404   :  { %v1502_v7 = vpop.xlane.xlu1 %1501 }
 0x40e   :  { %v1499_v3 = vpop.xlane.xlu0 %1498 }
 0x40f   :  { %3968 = vrcp.f32 %v1499_v3 }
 0x411   :  { %v1505_v15 = vpop.xlane.xlu1 %1504 }
 0x413   :  { %v1493_v6 = vpop.xlane.xlu0 %1492 }
 0x414   :  { %3970 = vrcp.f32 %v1493_v6 }
 0x415   :  { %3972 = vrcp.f32 %v1502_v7  ;;  %v1511_v34 = vpop.xlane.xlu1 %1510 }
 0x417   :  { %v1496_v63 = vpop.xlane.xlu0 %1495 }
 0x418   :  { %3974 = vrcp.f32 %v1496_v63 }
 0x419   :  { %v3969_v8 = vpop.eup %3968  ;;  %3976 = vrcp.f32 %v1505_v15 }
 0x41a   :  { %v1517_v18 = vpop.xlane.xlu1 %1516 }
 0x41c   :  { %v1508_v33 = vpop.xlane.xlu0 %1507 }
 0x41d   :  { %3978 = vrcp.f32 %v1508_v33  ;;  %v3590_v33 = vld [vmem:[%s4624_s3] ss:$0 sm:$0xff] }
 0x41e   :  { %v3971_v57 = vpop.eup %3970  ;;  %3980 = vrcp.f32 %v1511_v34  ;;  %v1523_v17 = vpop.xlane.xlu1 %1522 }
 0x41f   :  { %v3973_v5 = vpop.eup %3972  ;;  %v2771_v26 = vmul.f32 %v3971_v57, %v1611_v58 }
 0x422   :  { %v3975_v31 = vpop.eup %3974 }
 0x423   :  { %v2772_v32 = vmul.f32 %v3975_v31, %v1687_v55  ;;  %v3977_v35 = vpop.eup %3976 }
 0x427   :  { %v3979_v21 = vpop.eup %3978 }
 0x428   :  { %v3981_v43 = vpop.eup %3980 }
 0x445   :  { %v1763_v9 = vpop.f32.mrb[12].mxu0 }
 0x446   :  { %v2773_v13 = vmul.f32 %v3969_v8, %v1763_v9  ;;  %v3790_v14 = vpop.f32.mrb[13].mxu0  ;;  %v1529_v60 = vpop.xlane.xlu1 %1528  ;;  %v3400_v9 = vld [vmem:[#allocation7 + $0x1c] sm:$0xf] }
 0x448   :  { %3858 = vmatprep.mubr.msk.f32.mxu0 %vm179_vm2, %v2773_v13 }
 0x449   :  { %v1839_v16 = vpop.f32.mrb[26].mxu1 }
 0x44a   :  { %v2774_v22 = vmul.f32 %v3973_v5, %v1839_v16  ;;  %v3795_v23 = vpop.f32.mrb[27].mxu1  ;;  %v1514_v11 = vpop.xlane.xlu0 %1513 }
 0x44b   :  { %3982 = vrcp.f32 %v1514_v11 }
 0x44c   :  { %3859 = vmatmul.mubr.msk.f32.vlgmr.msra.gmra.mrb[26].mxu0 %vm179_vm2, %v2774_v22  ;;  %3984 = vrcp.f32 %v1517_v18 }
 0x44d   :  { %3863 = vmatprep.mubr.msk.f32.mxu0 %vm179_vm2, %v2771_v26  ;;  %3862 = vmatpush3.msk.msra.mxu0 %vm2796_vm4, %v2787_v0 }
 0x44e   :  { %3866 = vmatprep.subr.msk.mxu0 %vm2796_vm4, %v2960_v29  ;;  %v1535_v13 = vpop.xlane.xlu1 %1534 }
 0x452   :  { %v1520_v4 = vpop.xlane.xlu0 %1519 }
 0x453   :  { %3986 = vrcp.f32 %v1520_v4 }
 0x454   :  { %3864 = vmatmul.mubr.msk.f32.vlgmr.msra.gmra.mrb[26].mxu0 %vm179_vm2, %v2772_v32  ;;  %3988 = vrcp.f32 %v1523_v17 }
 0x455   :  { %3867 = vmatpush3.msk.msra.mxu0 %vm2796_vm4, %v2960_v29  ;;  %v3983_v51 = vpop.eup %3982 }
 0x456   :  { %v1915_v36 = vpop.f32.mrb[14].mxu0  ;;  %3871 = vmatprep.subr.msk.mxu0 %vm2796_vm4, %v3048_v27  ;;  %v3985_v53 = vpop.eup %3984 }
 0x457   :  { %v2775_v37 = vmul.f32 %v3977_v35, %v1915_v36  ;;  %v3800_v38 = vpop.f32.mrb[15].mxu0  ;;  %v1526_v59 = vpop.xlane.xlu0 %1525 }
 0x458   :  { %3990 = vrcp.f32 %v1526_v59 }
 0x459   :  { %3868 = vmatprep.mubr.msk.f32.mxu0 %vm179_vm2, %v2775_v37  ;;  %3992 = vrcp.f32 %v1529_v60 }
 0x45a   :  { %v2067_v20 = vpop.f32.mrb[16].mxu0 }
 0x45b   :  { %v3810_v39 = vpop.f32.mrb[17].mxu0  ;;  %v2777_v12 = vmul.f32 %v3981_v43, %v2067_v20  ;;  %v1532_v1 = vpop.xlane.xlu0 %1531 }
 0x45c   :  { %3994 = vrcp.f32 %v1532_v1 }
 0x45d   :  { %v3987_v25 = vpop.eup %3986  ;;  %3996 = vrcp.f32 %v1535_v13 }
 0x45e   :  { %v2219_v40 = vpop.f32.mrb[18].mxu0  ;;  %v3989_v52 = vpop.eup %3988 }
 0x45f   :  { %v1991_v41 = vpop.f32.mrb[28].mxu1  ;;  %v3820_v42 = vpop.f32.mrb[19].mxu0  ;;  %v2779_v54 = vmul.f32 %v3985_v53, %v2219_v40 }
 0x460   :  { %v2776_v44 = vmul.f32 %v3979_v21, %v1991_v41  ;;  %v3805_v46 = vpop.f32.mrb[29].mxu1 }
 0x462   :  { %3869 = vmatmul.mubr.msk.f32.vlgmr.msra.gmra.mrb[26].mxu0 %vm179_vm2, %v2776_v44  ;;  %v2371_v48 = vpop.f32.mrb[20].mxu0  ;;  %v3991_v2 = vpop.eup %3990 }
 0x463   :  { %3873 = vmatprep.mubr.msk.f32.mxu0 %vm179_vm2, %v2777_v12  ;;  %v3830_v62 = vpop.f32.mrb[21].mxu0  ;;  %3872 = vmatpush3.msk.msra.mxu0 %vm2796_vm4, %v3048_v27  ;;  %v2781_v58 = vmul.f32 %v3989_v52, %v2371_v48  ;;  %v3993_v6 = vpop.eup %3992 }
 0x464   :  { %3876 = vmatprep.subr.msk.mxu0 %vm2796_vm4, %v3136_v47 }
 0x466   :  { %v3995_v14 = vpop.eup %3994 }
 0x467   :  { %v3997_v15 = vpop.eup %3996 }
 0x477   :  { %v1538_v5 = vpop.xlane.xlu0 %1537 }
 0x478   :  { %3998 = vrcp.f32 %v1538_v5 }
 0x482   :  { %v3999_v26 = vpop.eup %3998 }
 0x48b   :  { %v2523_v50 = vpop.f32.mrb[22].mxu0 }
 0x48c   :  { %v3840_v19 = vpop.f32.mrb[23].mxu0  ;;  %v2783_v8 = vmul.f32 %v3993_v6, %v2523_v50 }
 0x48f   :  { %v2143_v24 = vpop.f32.mrb[30].mxu1 }
 0x490   :  { %v2778_v30 = vmul.f32 %v3983_v51, %v2143_v24  ;;  %v3815_v28 = vpop.f32.mrb[31].mxu1 }
 0x492   :  { %3874 = vmatmul.mubr.msk.f32.vlgmr.msra.gmra.mrb[26].mxu0 %vm179_vm2, %v2778_v30 }
 0x493   :  { %3878 = vmatprep.mubr.msk.f32.mxu0 %vm179_vm2, %v2779_v54  ;;  %3877 = vmatpush3.msk.msra.mxu0 %vm2796_vm4, %v3136_v47 }
 0x494   :  { %3881 = vmatprep.subr.msk.mxu0 %vm2796_vm4, %v3224_v56 }
 0x497   :  { %v2295_v49 = vpop.f32.mrb[32].mxu1 }
 0x498   :  { %v2780_v61 = vmul.f32 %v3987_v25, %v2295_v49  ;;  %v3825_v0 = vpop.f32.mrb[33].mxu1 }
 0x49a   :  { %3879 = vmatmul.mubr.msk.f32.vlgmr.msra.gmra.mrb[26].mxu0 %vm179_vm2, %v2780_v61 }
 0x49b   :  { %v2447_v45 = vpop.f32.mrb[34].mxu1  ;;  %3883 = vmatprep.mubr.msk.f32.mxu0 %vm179_vm2, %v2781_v58  ;;  %3882 = vmatpush3.msk.msra.mxu0 %vm2796_vm4, %v3224_v56 }
 0x49c   :  { %v3835_v55 = vpop.f32.mrb[35].mxu1  ;;  %3886 = vmatprep.subr.msk.mxu0 %vm2796_vm4, %v3312_v10  ;;  %v2782_v7 = vmul.f32 %v3991_v2, %v2447_v45 }
 0x49f   :  { %v2599_v3 = vpop.f32.mrb[36].mxu1 }
 0x4a0   :  { %v3845_v63 = vpop.f32.mrb[37].mxu1  ;;  %v2784_v57 = vmul.f32 %v3995_v14, %v2599_v3 }
 0x4a2   :  { %3884 = vmatmul.mubr.msk.f32.vlgmr.msra.gmra.mrb[26].mxu0 %vm179_vm2, %v2782_v7 }
 0x4a3   :  { %3888 = vmatprep.mubr.msk.f32.mxu0 %vm179_vm2, %v2783_v8  ;;  %3887 = vmatpush3.msk.msra.mxu0 %vm2796_vm4, %v3312_v10 }
 0x4a4   :  { %3891 = vmatprep.subr.msk.mxu0 %vm2796_vm4, %v3400_v9 }
 0x4aa   :  { %3889 = vmatmul.mubr.msk.f32.vlgmr.msra.gmra.mrb[26].mxu0 %vm179_vm2, %v2784_v57 }
 0x4ab   :  { %3892 = vmatpush3.msk.msra.mxu0 %vm2796_vm4, %v3400_v9 }
 0x4b2   :  { %v2675_v16 = vpop.f32.mrb[24].mxu0 }
 0x4b3   :  { %v2785_v22 = vmul.f32 %v3997_v15, %v2675_v16  ;;  %v3850_v23 = vpop.f32.mrb[25].mxu0 }
 0x4b5   :  { %3893 = vmatprep.mubr.msk.f32.mxu0 %vm179_vm2, %v2785_v22 }
 0x4bc   :  { %v2751_v29 = vpop.f32.mrb[38].mxu1 }
 0x4bd   :  { %v2786_v31 = vmul.f32 %v3999_v26, %v2751_v29  ;;  %v3855_v32 = vpop.f32.mrb[39].mxu1 }
 0x4bf   :  { %3894 = vmatmul.mubr.msk.f32.vlgmr.msra.gmra.mrb[26].mxu0 %vm179_vm2, %v2786_v31 }
 0x592   :  { %v3895_v34 = vpop.f32.mrb[26].mxu0 }
 0x593   :  { %v3495_v27 = vadd.f32 %v3895_v34, %v3590_v33  ;;  %v3476_v35 = vpop.f32.mrb[27].mxu0 }
 0x594   :  { %v3494_v36 = vadd.f32 %v3590_v33, %v3476_v35 }
 0x595   :  { %3497 = vst.msk [vmem:[#allocation8 + $0x8] sm:$0xff] %vm65_vm0, %v3495_v27 }
 0x596   :  { %3496 = vst.msk [vmem:[#allocation8] sm:$0xff] %vm65_vm0, %v3494_v36 }
 0x597   :  { %4077 = shalt.err (!%p4074_p0)
}
 0x598   :  { %s4078_s15 = scalar_lea.hbm %s4625_s4, 256 }
 0x599   :  { %p4079_p1 = scmp.ne.s32.totalorder %s4625_s4, %s4078_s15  ;;  %p4082_p2 = scmp.lt.u32.totalorder %s4078_s15, %s4625_s4 }
 0x59b   :  { %p4084_p3 = pnand %p4082_p2, %p4079_p1 }
 0x59d   :  { %4087 = shalt.err (!%p4084_p3)
}
 0x59e   :  { %3509 = dma.vmem_to_hbm [thread:$0]  %s3504_s1, 256, %s4625_s4, [#allocation4], %s4096_s27, %s4096_s27, %s4097_s28  }
 0x59f   :  { %4092 = dma.done.wait [#allocation4], 256  }
 0x5a0   :  { %4093 = vsyncadd [#allocation4], 4294967040 }
 0x5a1   :  { %3513 = vsyncpa [#allocation3], 1 }
 0x5a2   :  { %3514 = vsyncpa [#allocation6], 1 }
 0x5a3   :  { %3515 = vsyncpa [#allocation4], 1 }

// kernel: tpu_custom_call.1
= control target key start
LH: loop header
LB: loop body
LE: loop exit
PB: predicated region body
PF: predicated region fallthrough
CT: control target
= control target key end

     0   :  { %9 = vsyncpa [#allocation3], 0  ;;  %s4621_s0 = inlined_call_operand.hbm [shape: f32[2,8,32], index: 0, kind: input, shape index: {}]   ;;  %s4622_s1 = inlined_call_operand.hbm [shape: f32[32,96], index: 1, kind: input, shape index: {}]   ;;  %s4623_s2 = inlined_call_operand.hbm [shape: f32[8,4,32], index: 2, kind: input, shape index: {}]   ;;  %s4624_s3 = inlined_call_operand.vmem [shape: f32[1,32], index: 3, kind: input, shape index: {}]   ;;  %s4625_s4 = inlined_call_operand.hbm [shape: f32[2,8,32], index: 4, kind: output, shape index: {}]  }
   0x1   :  { %10 = vsyncpa [#allocation6], 0 }
   0x2   :  { %11 = vsyncpa [#allocation4], 0  ;;  %s4094_s15 = smov [#allocation5]   ;;  %s4095_s17 = smov [#allocation2]  }
   0x3   :  { %s29_s16 = sshll.u32 %s4094_s15, 4  ;;  %s17_s18 = sshll.u32 %s4095_s17, 4  ;;  %s30_s16 = int_to_ptr.vmem [resolvable:$true] %s29_s16  ;;  %s4137_s18 = int_to_ptr.vmem [resolvable:$true] %s17_s18 }
   0x4   :  { %s4000_s21 = scalar_lea.hbm %s4622_s1, 512 }
   0x5   :  { %p4001_p0 = scmp.ne.s32.totalorder %s4622_s1, %s4000_s21  ;;  %p4004_p1 = scmp.lt.u32.totalorder %s4000_s21, %s4622_s1 }
   0x7   :  { %p4006_p2 = pnand %p4004_p1, %p4001_p0 }
   0x9   :  { %4009 = shalt.err (!%p4006_p2)
}
   0xa   :  { %s4010_s26 = scalar_lea.vmem %s30_s16, 512  ;;  %p4015_p4 = scmp.lt.s32.totalorder %s30_s16, %s30_s16 }
   0xb   :  { %p4011_p3 = scmp.ne.s32.totalorder %s30_s16, %s4010_s26  ;;  %p4016_p5 = scmp.lt.s32.totalorder %s4010_s26, %s4010_s26 }
   0xd   :  { %p4017_p6 = por %p4016_p5, %p4015_p4 }
   0xf   :  { %p4018_p7 = pnand %p4017_p6, %p4011_p3 }
  0x11   :  { %4021 = shalt.err (!%p4018_p7)
}
  0x12   :  { %s4096_s27 = smov 128   ;;  %s4097_s28 = smov 8  }
  0x13   :  { %35 = dma.hbm_to_vmem [thread:$0]  %s4622_s1, 512, %s30_s16, [#allocation6], %s4096_s27, %s4096_s27, %s4097_s28  }
  0x14   :  { %s4022_s7 = scalar_lea.hbm %s4621_s0, 256 }
  0x15   :  { %p4023_p8 = scmp.ne.s32.totalorder %s4621_s0, %s4022_s7  ;;  %p4026_p9 = scmp.lt.u32.totalorder %s4022_s7, %s4621_s0 }
  0x17   :  { %p4028_p10 = pnand %p4026_p9, %p4023_p8 }
  0x19   :  { %4031 = shalt.err (!%p4028_p10)
}
  0x1a   :  { %s4032_s12 = scalar_lea.vmem %s4137_s18, 256  ;;  %p4037_p12 = scmp.lt.s32.totalorder %s4137_s18, %s4137_s18 }
  0x1b   :  { %p4033_p11 = scmp.ne.s32.totalorder %s4137_s18, %s4032_s12  ;;  %p4038_p13 = scmp.lt.s32.totalorder %s4032_s12, %s4032_s12 }
  0x1d   :  { %p4039_p0 = por %p4038_p13, %p4037_p12 }
  0x1f   :  { %p4040_p1 = pnand %p4039_p0, %p4033_p11 }
  0x21   :  { %4043 = shalt.err (!%p4040_p1)
}
  0x22   :  { %23 = dma.hbm_to_vmem [thread:$0]  %s4621_s0, 256, %s4137_s18, [#allocation3], %s4096_s27, %s4096_s27, %s4097_s28  }
  0x23   :  { %s4098_s14 = smov [#allocation7]   ;;  %s4044_s19 = scalar_lea.hbm %s4623_s2, 512 }
  0x24   :  { %s41_s15 = sshll.u32 %s4098_s14, 4  ;;  %p4045_p2 = scmp.ne.s32.totalorder %s4623_s2, %s4044_s19  ;;  %s42_s15 = int_to_ptr.vmem [resolvable:$true] %s41_s15 }
  0x25   :  { %p4048_p3 = scmp.lt.u32.totalorder %s4044_s19, %s4623_s2 }
  0x27   :  { %p4050_p4 = pnand %p4048_p3, %p4045_p2 }
  0x29   :  { %4053 = shalt.err (!%p4050_p4)
}
  0x2a   :  { %s4054_s24 = scalar_lea.vmem %s42_s15, 512  ;;  %p4059_p6 = scmp.lt.s32.totalorder %s42_s15, %s42_s15 }
  0x2b   :  { %p4055_p5 = scmp.ne.s32.totalorder %s42_s15, %s4054_s24  ;;  %p4060_p7 = scmp.lt.s32.totalorder %s4054_s24, %s4054_s24 }
  0x2d   :  { %p4061_p8 = por %p4060_p7, %p4059_p6 }
  0x2f   :  { %p4062_p9 = pnand %p4061_p8, %p4055_p5 }
  0x31   :  { %4065 = shalt.err (!%p4062_p9)
}
  0x32   :  { %s4099_s0 = smov 64   ;;  %s4100_s18 = smov 4  }
  0x33   :  { %47 = dma.hbm_to_vmem [thread:$0]  %s4623_s2, 512, %s42_s15, [#allocation6], %s4099_s0, %s4099_s0, %s4100_s18  }
  0x34   :  { %4088 = dma.done.wait [#allocation3], 256  }
  0x35   :  { %4089 = vsyncadd [#allocation3], 4294967040 }
  0x36   :  { %4090 = dma.done.wait [#allocation6], 1024  }
  0x37   :  { %4091 = vsyncadd [#allocation6], 4294966272  ;;  %vm65_vm0 = vcmask 261120   ;;  %v61_v0 = vld [vmem:[#allocation5] sm:$0xff]  ;;  %v62_v1 = vld [vmem:[#allocation5 + $0x8] sm:$0xff]  ;;  %s4101_s2 = smov 120  }
  0x38   :  { %v63_v2 = vld [vmem:[#allocation5 + $0x10] sm:$0xff]  ;;  %v3896_v3 = vpack.c.bf16 %v62_v1, %v61_v0  ;;  %v64_v4 = vld [vmem:[#allocation5 + $0x18] sm:$0xff]  ;;  %s4102_s29 = smov 124   ;;  %v4103_v10 = vmov 0.0   ;;  %s4104_s30 = smov 116   ;;  %vm4105_vm1 = vmmov 0  }
  0x39   :  { %v59_v5 = vld [vmem:[#allocation2] sm:$0xff]  ;;  %v3900_v6 = vpack.c.bf16 %v64_v4, %v63_v2  ;;  %v60_v7 = vld [vmem:[#allocation2 + $0x8] sm:$0xff]  ;;  %3726 = vmatprep.subr.mxu0 %v4103_v10  ;;  %3728 = vmatprep.mubr.msk.f32.mxu0 %vm4105_vm1, %v4103_v10  ;;  %s4106_s5 = smov 112   ;;  %s4107_s6 = smov 108   ;;  %vm179_vm2 = vcmask 31744   ;;  %vm1394_vm3 = vcmask 64512  }
  0x3a   :  { %3693 = vmatprep.mubr.msk.f32.mxu1 %vm65_vm0, %v59_v5  ;;  %3897 = vmatprep.subr.bf16.mxu1 %v3896_v3  ;;  %s4108_s7 = smov 104   ;;  %s4109_s8 = smov 96   ;;  %vm2796_vm4 = vcmask 1043456  }
  0x3b   :  { %3899 = vmatpush3.bf16.msra.mxu1 %v3896_v3  ;;  %s4110_s9 = smov 100   ;;  %s4111_s12 = smov [#allocation8]  }
  0x3c   :  { %3901 = vmatprep.subr.bf16.mxu1 %v3900_v6  ;;  %s3503_s1 = sshll.u32 %s4111_s12, 4  ;;  %s3504_s1 = int_to_ptr.vmem [resolvable:$true] %s3503_s1 }
  0x3d   :  { %s4066_s13 = scalar_lea.vmem %s3504_s1, 256  ;;  %p4071_p11 = scmp.lt.s32.totalorder %s3504_s1, %s3504_s1 }
  0x3e   :  { %p4067_p10 = scmp.ne.s32.totalorder %s3504_s1, %s4066_s13  ;;  %p4072_p12 = scmp.lt.s32.totalorder %s4066_s13, %s4066_s13 }
  0x3f   :  { %3903 = vmatpush3.bf16.msra.mxu1 %v3900_v6 }
  0x40   :  { %3696 = vmatprep.subr.mxu1 %v4103_v10  ;;  %p4073_p13 = por %p4072_p12, %p4071_p11 }
  0x42   :  { %3694 = vmatmul.mubr.msk.f32.vlgmr.msra.gmra.mrb[0].mxu1 %vm65_vm0, %v60_v7  ;;  %p4074_p0 = pnand %p4073_p13, %p4067_p10 }
  0x43   :  { %3698 = vmatprep.mubr.msk.f32.mxu1 %vm4105_vm1, %v4103_v10 }
 0x115   :  { %v4190_v8 = vpop.f32.mrb[0].mxu1 }
 0x116   :  { %v4192_v9 = vpop.f32.mrb[1].mxu1 }
 0x117   :  { %153 = vrot.lane.b32.xlu1 %v4192_v9, %s4101_s2  ;;  %149 = vrot.lane.b32.xlu0 %v4192_v9, %s4102_s29 }
 0x11b   :  { %155 = vrot.lane.b32.xlu1 %v4190_v8, %s4101_s2  ;;  %151 = vrot.lane.b32.xlu0 %v4190_v8, %s4102_s29 }
 0x11f   :  { %159 = vrot.lane.b32.xlu1 %v4190_v8, %s4104_s30  ;;  %157 = vrot.lane.b32.xlu0 %v4192_v9, %s4104_s30 }
 0x123   :  { %163 = vrot.lane.b32.xlu1 %v4190_v8, %s4106_s5  ;;  %161 = vrot.lane.b32.xlu0 %v4192_v9, %s4106_s5 }
 0x127   :  { %167 = vrot.lane.b32.xlu1 %v4190_v8, %s4107_s6  ;;  %165 = vrot.lane.b32.xlu0 %v4192_v9, %s4107_s6 }
 0x12b   :  { %169 = vrot.lane.b32.xlu1 %v4192_v9, %s4108_s7  ;;  %177 = vrot.lane.b32.xlu0 %v4192_v9, %s4109_s8 }
 0x12f   :  { %254 = vrot.lane.b32.xlu1 %v4190_v8, %s4109_s8  ;;  %171 = vrot.lane.b32.xlu0 %v4190_v8, %s4108_s7 }
 0x133   :  { %173 = vrot.lane.b32.xlu1 %v4192_v9, %s4110_s9 }
 0x189   :  { %v4217_v11 = vpop.permute.xlu1 %153  ;;  %v150_v12 = vpop.permute.xlu0 %149 }
 0x18a   :  { %330 = vrot.lane.b32.xlu0 %v150_v12, %s4109_s8 }
 0x18d   :  { %v4220_v13 = vpop.permute.xlu1 %155  ;;  %v152_v14 = vpop.permute.xlu0 %151 }
 0x18e   :  { %175 = vrot.lane.b32.xlu0 %v4190_v8, %s4110_s9  ;;  %406 = vrot.lane.b32.xlu1 %v152_v14, %s4109_s8 }
 0x191   :  { %v4224_v15 = vpop.permute.xlu1 %159  ;;  %v4226_v16 = vpop.permute.xlu0 %157 }
 0x192   :  { %482 = vrot.lane.b32.xlu0 %v4217_v11, %s4109_s8  ;;  %558 = vrot.lane.b32.xlu1 %v4220_v13, %s4109_s8 }
 0x195   :  { %v4232_v17 = vpop.permute.xlu1 %163  ;;  %v4234_v18 = vpop.permute.xlu0 %161 }
 0x196   :  { %710 = vrot.lane.b32.xlu1 %v4224_v15, %s4109_s8  ;;  %634 = vrot.lane.b32.xlu0 %v4226_v16, %s4109_s8 }
 0x199   :  { %v4240_v19 = vpop.permute.xlu1 %167  ;;  %v4242_v20 = vpop.permute.xlu0 %165 }
 0x19a   :  { %862 = vrot.lane.b32.xlu1 %v4232_v17, %s4109_s8  ;;  %786 = vrot.lane.b32.xlu0 %v4234_v18, %s4109_s8 }
 0x19d   :  { %v4248_v21 = vpop.permute.xlu1 %169  ;;  %v178_v22 = vpop.permute.xlu0 %177 }
 0x19e   :  { %1014 = vrot.lane.b32.xlu1 %v4240_v19, %s4109_s8  ;;  %938 = vrot.lane.b32.xlu0 %v4242_v20, %s4109_s8 }
 0x19f   :  { %3697 = vmatpush3.xpose.msk.msra.mxu1 %vm179_vm2, %v178_v22 }
 0x1a0   :  { %3701 = vmatprep.subr.mxu1 %v4103_v10 }
 0x1a1   :  { %v255_v23 = vpop.permute.xlu1 %254  ;;  %v4256_v24 = vpop.permute.xlu0 %171 }
 0x1a2   :  { %3699 = vmatmul.mubr.msk.f32.vlgmr.msra.gmra.mrb[2].mxu1 %vm179_vm2, %v4192_v9  ;;  %1090 = vrot.lane.b32.xlu0 %v4248_v21, %s4109_s8 }
 0x1a3   :  { %3702 = vmatpush3.xpose.msk.msra.mxu1 %vm179_vm2, %v255_v23  ;;  %1166 = vrot.lane.b32.xlu1 %v4256_v24, %s4109_s8 }
 0x1a4   :  { %3703 = vmatprep.mubr.msk.f32.mxu1 %vm4105_vm1, %v4103_v10  ;;  %3706 = vmatprep.subr.mxu1 %v4103_v10 }
 0x1a5   :  { %v4268_v25 = vpop.permute.xlu1 %173 }
 0x1a6   :  { %3704 = vmatmul.mubr.msk.f32.vlgmr.msra.gmra.mrb[4].mxu1 %vm179_vm2, %v4190_v8  ;;  %1242 = vrot.lane.b32.xlu0 %v4268_v25, %s4109_s8 }
 0x1a7   :  { %3708 = vmatprep.mubr.msk.f32.mxu1 %vm4105_vm1, %v4103_v10 }
 0x1aa   :  { %1539 = vrot.lane.b32.xlu0 %v4192_v9, %s4099_s0 }
 0x1ae   :  { %1919 = vrot.lane.b32.xlu0 %v4220_v13, %s4099_s0 }
 0x1b2   :  { %2071 = vrot.lane.b32.xlu0 %v4224_v15, %s4099_s0 }
 0x1b6   :  { %2223 = vrot.lane.b32.xlu0 %v4232_v17, %s4099_s0 }
 0x1ba   :  { %1691 = vrot.lane.b32.xlu0 %v150_v12, %s4099_s0 }
 0x1fc   :  { %v331_v26 = vpop.permute.xlu0 %330 }
 0x1fd   :  { %3707 = vmatpush3.xpose.msk.msra.mxu1 %vm179_vm2, %v331_v26 }
 0x1fe   :  { %3711 = vmatprep.subr.mxu1 %v4103_v10 }
 0x200   :  { %v407_v27 = vpop.permute.xlu1 %406  ;;  %3709 = vmatmul.mubr.msk.f32.vlgmr.msra.gmra.mrb[6].mxu1 %vm179_vm2, %v150_v12  ;;  %v4288_v28 = vpop.permute.xlu0 %175 }
 0x201   :  { %3712 = vmatpush3.xpose.msk.msra.mxu1 %vm179_vm2, %v407_v27  ;;  %1318 = vrot.lane.b32.xlu1 %v4288_v28, %s4109_s8 }
 0x202   :  { %3713 = vmatprep.mubr.msk.f32.mxu1 %vm4105_vm1, %v4103_v10  ;;  %3716 = vmatprep.subr.mxu1 %v4103_v10 }
 0x204   :  { %v559_v29 = vpop.permute.xlu1 %558  ;;  %3714 = vmatmul.mubr.msk.f32.vlgmr.msra.gmra.mrb[8].mxu1 %vm179_vm2, %v152_v14  ;;  %v483_v30 = vpop.permute.xlu0 %482 }
 0x205   :  { %1615 = vrot.lane.b32.xlu1 %v4190_v8, %s4099_s0  ;;  %3717 = vmatpush3.xpose.msk.msra.mxu1 %vm179_vm2, %v483_v30 }
 0x206   :  { %3718 = vmatprep.mubr.msk.f32.mxu1 %vm4105_vm1, %v4103_v10  ;;  %3721 = vmatprep.subr.mxu1 %v4103_v10 }
 0x208   :  { %v711_v31 = vpop.permute.xlu1 %710  ;;  %3719 = vmatmul.mubr.msk.f32.vlgmr.msra.gmra.mrb[10].mxu1 %vm179_vm2, %v4217_v11  ;;  %v635_v32 = vpop.permute.xlu0 %634 }
 0x209   :  { %1767 = vrot.lane.b32.xlu1 %v152_v14, %s4099_s0  ;;  %3722 = vmatpush3.xpose.msk.msra.mxu1 %vm179_vm2, %v559_v29 }
 0x20a   :  { %3727 = vmatpush3.xpose.msk.msra.mxu0 %vm179_vm2, %v635_v32  ;;  %3723 = vmatprep.mubr.msk.f32.mxu1 %vm4105_vm1, %v4103_v10 }
 0x20b   :  { %3731 = vmatprep.subr.mxu1 %v4103_v10  ;;  %3736 = vmatprep.subr.mxu0 %v4103_v10 }
 0x20c   :  { %3724 = vmatmul.mubr.msk.f32.vlgmr.msra.gmra.mrb[12].mxu1 %vm179_vm2, %v4220_v13  ;;  %v787_v33 = vpop.permute.xlu0 %786  ;;  %v863_v34 = vpop.permute.xlu1 %862 }
 0x20d   :  { %3729 = vmatmul.mubr.msk.f32.vlgmr.msra.gmra.mrb[0].mxu0 %vm179_vm2, %v4226_v16  ;;  %1843 = vrot.lane.b32.xlu1 %v4217_v11, %s4099_s0 }
 0x20e   :  { %3732 = vmatpush3.xpose.msk.msra.mxu1 %vm179_vm2, %v711_v31  ;;  %3737 = vmatpush3.xpose.msk.msra.mxu0 %vm179_vm2, %v787_v33 }
 0x20f   :  { %3733 = vmatprep.mubr.msk.f32.mxu1 %vm4105_vm1, %v4103_v10  ;;  %3738 = vmatprep.mubr.msk.f32.mxu0 %vm4105_vm1, %v4103_v10 }
 0x210   :  { %3741 = vmatprep.subr.mxu1 %v4103_v10  ;;  %3746 = vmatprep.subr.mxu0 %v4103_v10  ;;  %v939_v35 = vpop.permute.xlu0 %938  ;;  %v1015_v36 = vpop.permute.xlu1 %1014 }
 0x211   :  { %3734 = vmatmul.mubr.msk.f32.vlgmr.msra.gmra.mrb[14].mxu1 %vm179_vm2, %v4224_v15  ;;  %3739 = vmatmul.mubr.msk.f32.vlgmr.msra.gmra.mrb[2].mxu0 %vm179_vm2, %v4234_v18 }
 0x212   :  { %1995 = vrot.lane.b32.xlu1 %v4226_v16, %s4099_s0  ;;  %3742 = vmatpush3.xpose.msk.msra.mxu1 %vm179_vm2, %v863_v34 }
 0x213   :  { %3747 = vmatpush3.xpose.msk.msra.mxu0 %vm179_vm2, %v939_v35  ;;  %3743 = vmatprep.mubr.msk.f32.mxu1 %vm4105_vm1, %v4103_v10 }
 0x214   :  { %3748 = vmatprep.mubr.msk.f32.mxu0 %vm4105_vm1, %v4103_v10  ;;  %3751 = vmatprep.subr.mxu1 %v4103_v10  ;;  %v1091_v37 = vpop.permute.xlu0 %1090 }
 0x215   :  { %3744 = vmatmul.mubr.msk.f32.vlgmr.msra.gmra.mrb[16].mxu1 %vm179_vm2, %v4232_v17  ;;  %3756 = vmatprep.subr.mxu0 %v4103_v10  ;;  %v1167_v39 = vpop.permute.xlu1 %1166 }
 0x216   :  { %3749 = vmatmul.mubr.msk.f32.vlgmr.msra.gmra.mrb[4].mxu0 %vm179_vm2, %v4242_v20  ;;  %2147 = vrot.lane.b32.xlu1 %v4234_v18, %s4099_s0 }
 0x217   :  { %3752 = vmatpush3.xpose.msk.msra.mxu1 %vm179_vm2, %v1015_v36  ;;  %3757 = vmatpush3.xpose.msk.msra.mxu0 %vm179_vm2, %v1091_v37 }
 0x218   :  { %3753 = vmatprep.mubr.msk.f32.mxu1 %vm4105_vm1, %v4103_v10  ;;  %3758 = vmatprep.mubr.msk.f32.mxu0 %vm4105_vm1, %v4103_v10  ;;  %v1243_v38 = vpop.permute.xlu0 %1242 }
 0x219   :  { %3761 = vmatprep.subr.mxu1 %v4103_v10  ;;  %3766 = vmatprep.subr.mxu0 %v4103_v10 }
 0x21a   :  { %3754 = vmatmul.mubr.msk.f32.vlgmr.msra.gmra.mrb[18].mxu1 %vm179_vm2, %v4240_v19  ;;  %3759 = vmatmul.mubr.msk.f32.vlgmr.msra.gmra.mrb[6].mxu0 %vm179_vm2, %v4248_v21 }
 0x21b   :  { %3762 = vmatpush3.xpose.msk.msra.mxu1 %vm179_vm2, %v1167_v39  ;;  %3767 = vmatpush3.xpose.msk.msra.mxu0 %vm179_vm2, %v1243_v38 }
 0x21c   :  { %3763 = vmatprep.mubr.msk.f32.mxu1 %vm4105_vm1, %v4103_v10  ;;  %3768 = vmatprep.mubr.msk.f32.mxu0 %vm4105_vm1, %v4103_v10  ;;  %v1540_v40 = vpop.permute.xlu0 %1539 }
 0x21d   :  { %3776 = vmatprep.subr.mxu0 %v4103_v10  ;;  %3771 = vmatprep.subr.mxu1 %v4103_v10 }
 0x21e   :  { %3764 = vmatmul.mubr.msk.f32.vlgmr.msra.gmra.mrb[20].mxu1 %vm179_vm2, %v4256_v24  ;;  %3769 = vmatmul.mubr.msk.f32.vlgmr.msra.gmra.mrb[8].mxu0 %vm179_vm2, %v4268_v25 }
 0x21f   :  { %3777 = vmatpush3.msra.mxu0 %v1540_v40  ;;  %3773 = vmatprep.mubr.msk.f32.mxu1 %vm4105_vm1, %v4103_v10 }
 0x220   :  { %3778 = vmatprep.mubr.msk.f32.mxu0 %vm4105_vm1, %v4103_v10  ;;  %3786 = vmatprep.subr.mxu0 %v4103_v10  ;;  %v4420_v9 = vpop.permute.xlu0 %1919 }
 0x224   :  { %v4434_v27 = vpop.permute.xlu0 %2071 }
 0x228   :  { %v4438_v30 = vpop.permute.xlu0 %2223 }
 0x22c   :  { %v1692_v32 = vpop.permute.xlu0 %1691 }
 0x273   :  { %v1319_v41 = vpop.permute.xlu1 %1318 }
 0x274   :  { %3772 = vmatpush3.xpose.msk.msra.mxu1 %vm179_vm2, %v1319_v41 }
 0x275   :  { %v4376_v42 = vpop.f32.mrb[2].mxu1  ;;  %3781 = vmatprep.subr.mxu1 %v4103_v10 }
 0x276   :  { %v3700_v43 = vpop.f32.mrb[3].mxu1  ;;  %v1395_v44 = vsel %vm1394_vm3, %v4376_v42, -inf }
 0x277   :  { %1396 = vmax.xlane.f32.xlu0 %v1395_v44  ;;  %v1616_v45 = vpop.permute.xlu1 %1615  ;;  %3774 = vmatmul.mubr.msk.f32.vlgmr.msra.gmra.mrb[22].mxu1 %vm179_vm2, %v4288_v28 }
 0x278   :  { %3782 = vmatpush3.msra.mxu1 %v1616_v45  ;;  %3783 = vmatprep.mubr.msk.f32.mxu1 %vm4105_vm1, %v4103_v10 }
 0x279   :  { %v4385_v46 = vpop.f32.mrb[4].mxu1  ;;  %3791 = vmatprep.subr.mxu1 %v4103_v10 }
 0x27a   :  { %v3705_v47 = vpop.f32.mrb[5].mxu1  ;;  %v1398_v48 = vsel %vm1394_vm3, %v4385_v46, -inf }
 0x27b   :  { %1399 = vmax.xlane.f32.xlu1 %v1398_v48  ;;  %v1768_v16 = vpop.permute.xlu1 %1767 }
 0x27f   :  { %v1844_v29 = vpop.permute.xlu1 %1843 }
 0x284   :  { %v4440_v31 = vpop.permute.xlu1 %1995 }
 0x288   :  { %v4442_v33 = vpop.permute.xlu1 %2147 }
 0x2d3   :  { %v4390_v49 = vpop.f32.mrb[6].mxu1 }
 0x2d4   :  { %v3710_v50 = vpop.f32.mrb[7].mxu1  ;;  %v1401_v51 = vsel %vm1394_vm3, %v4390_v49, -inf }
 0x2d5   :  { %1402 = vmax.xlane.f32.xlu0 %v1401_v51 }
 0x2d7   :  { %v4394_v52 = vpop.f32.mrb[8].mxu1 }
 0x2d8   :  { %v3715_v53 = vpop.f32.mrb[9].mxu1  ;;  %v1404_v54 = vsel %vm1394_vm3, %v4394_v52, -inf }
 0x2d9   :  { %1405 = vmax.xlane.f32.xlu0 %v1404_v54 }
 0x2db   :  { %v4398_v55 = vpop.f32.mrb[10].mxu1 }
 0x2dc   :  { %v3720_v56 = vpop.f32.mrb[11].mxu1  ;;  %v1407_v2 = vsel %vm1394_vm3, %v4398_v55, -inf }
 0x2df   :  { %v4400_v57 = vpop.f32.mrb[12].mxu1 }
 0x2e0   :  { %v4402_v58 = vpop.f32.mrb[0].mxu0  ;;  %v3725_v59 = vpop.f32.mrb[13].mxu1  ;;  %v1410_v15 = vsel %vm1394_vm3, %v4400_v57, -inf }
 0x2e1   :  { %v3730_v60 = vpop.f32.mrb[1].mxu0  ;;  %v1413_v61 = vsel %vm1394_vm3, %v4402_v58, -inf }
 0x2e2   :  { %1414 = vmax.xlane.f32.xlu1 %v1413_v61 }
 0x2e4   :  { %v4406_v62 = vpop.f32.mrb[14].mxu1  ;;  %v4408_v63 = vpop.f32.mrb[2].mxu0 }
 0x2e5   :  { %v3735_v0 = vpop.f32.mrb[15].mxu1  ;;  %v3740_v1 = vpop.f32.mrb[3].mxu0  ;;  %v1419_v3 = vsel %vm1394_vm3, %v4408_v63, -inf  ;;  %v1416_v41 = vsel %vm1394_vm3, %v4406_v62, -inf }
 0x2e6   :  { %1408 = vmax.xlane.f32.xlu1 %v1407_v2  ;;  %1420 = vmax.xlane.f32.xlu0 %v1419_v3 }
 0x2e8   :  { %v4414_v4 = vpop.f32.mrb[16].mxu1 }
 0x2e9   :  { %v4416_v5 = vpop.f32.mrb[4].mxu0  ;;  %v3745_v6 = vpop.f32.mrb[17].mxu1  ;;  %v1422_v43 = vsel %vm1394_vm3, %v4414_v4, -inf }
 0x2ea   :  { %v3750_v7 = vpop.f32.mrb[5].mxu0  ;;  %v1425_v8 = vsel %vm1394_vm3, %v4416_v5, -inf }
 0x2eb   :  { %1426 = vmax.xlane.f32.xlu0 %v1425_v8 }
 0x2ed   :  { %v4422_v11 = vpop.f32.mrb[18].mxu1  ;;  %v4424_v12 = vpop.f32.mrb[6].mxu0 }
 0x2ee   :  { %v3755_v13 = vpop.f32.mrb[19].mxu1  ;;  %v3760_v14 = vpop.f32.mrb[7].mxu0  ;;  %v1428_v26 = vsel %vm1394_vm3, %v4422_v11, -inf }
 0x2ef   :  { %1411 = vmax.xlane.f32.xlu0 %v1410_v15 }
 0x2f1   :  { %v4428_v17 = vpop.f32.mrb[20].mxu1  ;;  %v4430_v18 = vpop.f32.mrb[8].mxu0 }
 0x2f2   :  { %v3765_v22 = vpop.f32.mrb[21].mxu1  ;;  %v3770_v23 = vpop.f32.mrb[9].mxu0  ;;  %v1434_v44 = vsel %vm1394_vm3, %v4428_v17, -inf }
 0x2f3   :  { %1429 = vmax.xlane.f32.xlu0 %v1428_v26 }
 0x2f7   :  { %2299 = vrot.lane.b32.xlu1 %v4242_v20, %s4099_s0 }
 0x304   :  { %v1397_v34 = vpop.xlane.xlu0 %1396 }
 0x305   :  { %v1443_v35 = vsub.f32 %v4376_v42, %v1397_v34  ;;  %v1437_v42 = vsel %vm1394_vm3, %v4430_v18, -inf }
 0x307   :  { %v1459_v36 = vmul.f32 1.442695, %v1443_v35 }
 0x308   :  { %v1400_v37 = vpop.xlane.xlu1 %1399 }
 0x309   :  { %3936 = vpow2.f32 %v1459_v36  ;;  %v1444_v38 = vsub.f32 %v4385_v46, %v1400_v37  ;;  %2451 = vrot.lane.b32.xlu0 %v4248_v21, %s4099_s0  ;;  %v1431_v21 = vsel %vm1394_vm3, %v4424_v12, -inf }
 0x30b   :  { %v1461_v20 = vmul.f32 1.442695, %v1444_v38 }
 0x30d   :  { %3938 = vpow2.f32 %v1461_v20 }
 0x313   :  { %v4448_v39 = vpop.eup %3936 }
 0x314   :  { %3779 = vmatmul.mubr.msk.f32.vlgmr.msra.gmra.mrb[10].mxu0 %vm1394_vm3, %v4448_v39 }
 0x315   :  { %3787 = vmatpush3.msra.mxu0 %v1692_v32  ;;  %3788 = vmatprep.mubr.msk.f32.mxu0 %vm4105_vm1, %v4103_v10 }
 0x316   :  { %3796 = vmatprep.subr.mxu0 %v4103_v10 }
 0x317   :  { %v4455_v40 = vpop.eup %3938 }
 0x318   :  { %3784 = vmatmul.mubr.msk.f32.vlgmr.msra.gmra.mrb[24].mxu1 %vm1394_vm3, %v4455_v40  ;;  %v1494_v22 = vsel %vm1394_vm3, %v4455_v40, 0.0 }
 0x319   :  { %3792 = vmatpush3.msra.mxu1 %v1768_v16  ;;  %3793 = vmatprep.mubr.msk.f32.mxu1 %vm4105_vm1, %v4103_v10 }
 0x31a   :  { %3801 = vmatprep.subr.mxu1 %v4103_v10 }
 0x31b   :  { %1432 = vmax.xlane.f32.xlu1 %v1431_v21 }
 0x31f   :  { %1417 = vmax.xlane.f32.xlu1 %v1416_v41 }
 0x323   :  { %1438 = vmax.xlane.f32.xlu1 %v1437_v42 }
 0x327   :  { %1423 = vmax.xlane.f32.xlu1 %v1422_v43 }
 0x328   :  { %1435 = vmax.xlane.f32.xlu0 %v1434_v44 }
 0x338   :  { %2375 = vrot.lane.b32.xlu1 %v4240_v19, %s4099_s0 }
 0x33c   :  { %2527 = vrot.lane.b32.xlu1 %v4256_v24, %s4099_s0 }
 0x340   :  { %2679 = vrot.lane.b32.xlu1 %v4288_v28, %s4099_s0 }
 0x34a   :  { %v4478_v45 = vpop.f32.mrb[22].mxu1 }
 0x34b   :  { %v3775_v46 = vpop.f32.mrb[23].mxu1  ;;  %v1440_v47 = vsel %vm1394_vm3, %v4478_v45, -inf }
 0x34c   :  { %1441 = vmax.xlane.f32.xlu0 %v1440_v47 }
 0x362   :  { %2603 = vrot.lane.b32.xlu0 %v4268_v25, %s4099_s0  ;;  %v1403_v48 = vpop.xlane.xlu0 %1402 }
 0x363   :  { %v1445_v50 = vsub.f32 %v4390_v49, %v1403_v48 }
 0x365   :  { %v1463_v19 = vmul.f32 1.442695, %v1445_v50 }
 0x366   :  { %v1406_v51 = vpop.xlane.xlu0 %1405 }
 0x367   :  { %3940 = vpow2.f32 %v1463_v19  ;;  %v1446_v24 = vsub.f32 %v4394_v52, %v1406_v51 }
 0x369   :  { %v1465_v53 = vmul.f32 1.442695, %v1446_v24 }
 0x36b   :  { %3942 = vpow2.f32 %v1465_v53 }
 0x36f   :  { %v1415_v28 = vpop.xlane.xlu1 %1414 }
 0x370   :  { %v1449_v56 = vsub.f32 %v4402_v58, %v1415_v28 }
 0x371   :  { %v3941_v54 = vpop.eup %3940 }
 0x372   :  { %3789 = vmatmul.mubr.msk.f32.vlgmr.msra.gmra.mrb[12].mxu0 %vm1394_vm3, %v3941_v54  ;;  %v1471_v52 = vmul.f32 1.442695, %v1449_v56  ;;  %v1497_v8 = vsel %vm1394_vm3, %v3941_v54, 0.0 }
 0x373   :  { %v1409_v59 = vpop.xlane.xlu1 %1408  ;;  %3797 = vmatpush3.msra.mxu0 %v1844_v29  ;;  %v1421_v60 = vpop.xlane.xlu0 %1420  ;;  %3798 = vmatprep.mubr.msk.f32.mxu0 %vm4105_vm1, %v4103_v10 }
 0x374   :  { %v1447_v25 = vsub.f32 %v4398_v55, %v1409_v59  ;;  %3806 = vmatprep.subr.mxu0 %v4103_v10  ;;  %v1451_v58 = vsub.f32 %v4408_v63, %v1421_v60 }
 0x375   :  { %v3943_v49 = vpop.eup %3942 }
 0x376   :  { %v1467_v61 = vmul.f32 1.442695, %v1447_v25  ;;  %3794 = vmatmul.mubr.msk.f32.vlgmr.msra.gmra.mrb[26].mxu1 %vm1394_vm3, %v3943_v49  ;;  %v1500_v0 = vsel %vm1394_vm3, %v3943_v49, 0.0  ;;  %v1475_v55 = vmul.f32 1.442695, %v1451_v58 }
 0x377   :  { %3802 = vmatpush3.msra.mxu1 %v4420_v9  ;;  %1501 = vadd.xlane.f32.xlu1 %v1500_v0  ;;  %v2300_v26 = vpop.permute.xlu1 %2299  ;;  %v2787_v0 = vld [vmem:[#allocation7] sm:$0xf] }
 0x378   :  { %3944 = vpow2.f32 %v1467_v61  ;;  %v1427_v1 = vpop.xlane.xlu0 %1426  ;;  %3803 = vmatprep.mubr.msk.f32.mxu1 %vm4105_vm1, %v4103_v10  ;;  %3811 = vmatprep.subr.mxu1 %v4103_v10 }
 0x379   :  { %3946 = vpow2.f32 %v1471_v52  ;;  %v1453_v2 = vsub.f32 %v4416_v5, %v1427_v1  ;;  %v2789_v52 = vld [vmem:[#allocation7 + $0x4] sm:$0xf] }
 0x37a   :  { %3948 = vpow2.f32 %v1475_v55 }
 0x37b   :  { %v1479_v7 = vmul.f32 1.442695, %v1453_v2 }
 0x37c   :  { %v1412_v3 = vpop.xlane.xlu0 %1411 }
 0x37d   :  { %v1448_v6 = vsub.f32 %v4400_v57, %v1412_v3  ;;  %v1491_v57 = vsel %vm1394_vm3, %v4448_v39, 0.0 }
 0x37f   :  { %v1469_v63 = vmul.f32 1.442695, %v1448_v6 }
 0x380   :  { %v1430_v16 = vpop.xlane.xlu0 %1429 }
 0x381   :  { %3950 = vpow2.f32 %v1469_v63  ;;  %1498 = vadd.xlane.f32.xlu0 %v1497_v8  ;;  %v1454_v21 = vsub.f32 %v4422_v11, %v1430_v16 }
 0x382   :  { %v3945_v9 = vpop.eup %3944  ;;  %3952 = vpow2.f32 %v1479_v7 }
 0x383   :  { %3799 = vmatmul.mubr.msk.f32.vlgmr.msra.gmra.mrb[14].mxu0 %vm1394_vm3, %v3945_v9  ;;  %v1503_v13 = vsel %vm1394_vm3, %v3945_v9, 0.0  ;;  %v3947_v14 = vpop.eup %3946 }
 0x384   :  { %3807 = vmatpush3.msra.mxu0 %v4440_v31  ;;  %1504 = vadd.xlane.f32.xlu1 %v1503_v13  ;;  %v1509_v5 = vsel %vm1394_vm3, %v3947_v14, 0.0  ;;  %v3949_v15 = vpop.eup %3948 }
 0x385   :  { %3808 = vmatprep.mubr.msk.f32.mxu0 %vm4105_vm1, %v4103_v10  ;;  %3816 = vmatprep.subr.mxu0 %v4103_v10  ;;  %v1515_v29 = vsel %vm1394_vm3, %v3949_v15, 0.0 }
 0x386   :  { %1492 = vadd.xlane.f32.xlu0 %v1491_v57 }
 0x387   :  { %3809 = vmatmul.mubr.msk.f32.vlgmr.msra.gmra.mrb[16].mxu0 %vm1394_vm3, %v3947_v14 }
 0x388   :  { %3817 = vmatpush3.msra.mxu0 %v4442_v33  ;;  %1510 = vadd.xlane.f32.xlu1 %v1509_v5  ;;  %v2452_v33 = vpop.permute.xlu0 %2451 }
 0x389   :  { %3818 = vmatprep.mubr.msk.f32.mxu0 %vm4105_vm1, %v4103_v10  ;;  %3826 = vmatprep.subr.mxu0 %v4103_v10 }
 0x38a   :  { %1495 = vadd.xlane.f32.xlu0 %v1494_v22 }
 0x38b   :  { %v3951_v23 = vpop.eup %3950  ;;  %3819 = vmatmul.mubr.msk.f32.vlgmr.msra.gmra.mrb[18].mxu0 %vm1394_vm3, %v3949_v15 }
 0x38c   :  { %3804 = vmatmul.mubr.msk.f32.vlgmr.msra.gmra.mrb[28].mxu1 %vm1394_vm3, %v3951_v23  ;;  %3827 = vmatpush3.msra.mxu0 %v2300_v26  ;;  %v3953_v31 = vpop.eup %3952  ;;  %v1506_v32 = vsel %vm1394_vm3, %v3951_v23, 0.0 }
 0x38d   :  { %3812 = vmatpush3.msra.mxu1 %v4434_v27  ;;  %1516 = vadd.xlane.f32.xlu1 %v1515_v29  ;;  %v1521_v34 = vsel %vm1394_vm3, %v3953_v31, 0.0  ;;  %v2960_v29 = vld [vmem:[#allocation7 + $0x8] sm:$0xf] }
 0x38e   :  { %3828 = vmatprep.mubr.msk.f32.mxu0 %vm4105_vm1, %v4103_v10  ;;  %3836 = vmatprep.subr.mxu0 %v4103_v10 }
 0x38f   :  { %1507 = vadd.xlane.f32.xlu0 %v1506_v32  ;;  %3829 = vmatmul.mubr.msk.f32.vlgmr.msra.gmra.mrb[20].mxu0 %vm1394_vm3, %v3953_v31 }
 0x390   :  { %3837 = vmatpush3.msra.mxu0 %v2452_v33  ;;  %3838 = vmatprep.mubr.msk.f32.mxu0 %vm4105_vm1, %v4103_v10 }
 0x391   :  { %1522 = vadd.xlane.f32.xlu1 %v1521_v34  ;;  %3813 = vmatprep.mubr.msk.f32.mxu1 %vm4105_vm1, %v4103_v10 }
 0x392   :  { %3821 = vmatprep.subr.mxu1 %v4103_v10  ;;  %3846 = vmatprep.subr.mxu0 %v4103_v10 }
 0x3a8   :  { %v1433_v27 = vpop.xlane.xlu1 %1432 }
 0x3a9   :  { %v1455_v35 = vsub.f32 %v4424_v12, %v1433_v27  ;;  %v1481_v12 = vmul.f32 1.442695, %v1454_v21  ;;  %v3048_v27 = vld [vmem:[#allocation7 + $0xc] sm:$0xf] }
 0x3ab   :  { %v1483_v36 = vmul.f32 1.442695, %v1455_v35 }
 0x3ac   :  { %v1418_v37 = vpop.xlane.xlu1 %1417 }
 0x3ad   :  { %3954 = vpow2.f32 %v1483_v36  ;;  %v1450_v38 = vsub.f32 %v4406_v62, %v1418_v37 }
 0x3af   :  { %v1473_v20 = vmul.f32 1.442695, %v1450_v38 }
 0x3b0   :  { %v1439_v39 = vpop.xlane.xlu1 %1438 }
 0x3b1   :  { %3956 = vpow2.f32 %v1473_v20  ;;  %v1457_v40 = vsub.f32 %v4430_v18, %v1439_v39 }
 0x3b3   :  { %v1487_v41 = vmul.f32 1.442695, %v1457_v40 }
 0x3b4   :  { %v1424_v42 = vpop.xlane.xlu1 %1423 }
 0x3b5   :  { %3958 = vpow2.f32 %v1487_v41  ;;  %v1452_v43 = vsub.f32 %v4414_v4, %v1424_v42  ;;  %v1436_v44 = vpop.xlane.xlu0 %1435 }
 0x3b6   :  { %v1456_v48 = vsub.f32 %v4428_v17, %v1436_v44 }
 0x3b7   :  { %v3955_v46 = vpop.eup %3954  ;;  %v1477_v47 = vmul.f32 1.442695, %v1452_v43 }
 0x3b8   :  { %3839 = vmatmul.mubr.msk.f32.vlgmr.msra.gmra.mrb[22].mxu0 %vm1394_vm3, %v3955_v46  ;;  %v1527_v62 = vsel %vm1394_vm3, %v3955_v46, 0.0  ;;  %v1485_v18 = vmul.f32 1.442695, %v1456_v48  ;;  %v2376_v50 = vpop.permute.xlu1 %2375 }
 0x3b9   :  { %3960 = vpow2.f32 %v1477_v47  ;;  %1528 = vadd.xlane.f32.xlu1 %v1527_v62  ;;  %3848 = vmatprep.mubr.msk.f32.mxu0 %vm4105_vm1, %v4103_v10  ;;  %v3136_v47 = vld [vmem:[#allocation7 + $0x10] sm:$0xf] }
 0x3ba   :  { %3962 = vpow2.f32 %v1481_v12 }
 0x3bb   :  { %v3957_v11 = vpop.eup %3956  ;;  %3964 = vpow2.f32 %v1485_v18 }
 0x3bc   :  { %3814 = vmatmul.mubr.msk.f32.vlgmr.msra.gmra.mrb[30].mxu1 %vm1394_vm3, %v3957_v11  ;;  %v1512_v4 = vsel %vm1394_vm3, %v3957_v11, 0.0 }
 0x3bd   :  { %3822 = vmatpush3.msra.mxu1 %v4438_v30  ;;  %1513 = vadd.xlane.f32.xlu0 %v1512_v4  ;;  %v2528_v30 = vpop.permute.xlu1 %2527 }
 0x3be   :  { %3823 = vmatprep.mubr.msk.f32.mxu1 %vm4105_vm1, %v4103_v10  ;;  %3831 = vmatprep.subr.mxu1 %v4103_v10 }
 0x3bf   :  { %v3959_v17 = vpop.eup %3958 }
 0x3c0   :  { %v1533_v19 = vsel %vm1394_vm3, %v3959_v17, 0.0 }
 0x3c1   :  { %1534 = vadd.xlane.f32.xlu1 %v1533_v19  ;;  %v2680_v56 = vpop.permute.xlu1 %2679 }
 0x3c3   :  { %v3961_v51 = vpop.eup %3960 }
 0x3c4   :  { %3824 = vmatmul.mubr.msk.f32.vlgmr.msra.gmra.mrb[32].mxu1 %vm1394_vm3, %v3961_v51  ;;  %v1518_v24 = vsel %vm1394_vm3, %v3961_v51, 0.0  ;;  %v3963_v53 = vpop.eup %3962 }
 0x3c5   :  { %3832 = vmatpush3.msra.mxu1 %v2376_v50  ;;  %1519 = vadd.xlane.f32.xlu0 %v1518_v24  ;;  %v1524_v28 = vsel %vm1394_vm3, %v3963_v53, 0.0  ;;  %v3965_v54 = vpop.eup %3964 }
 0x3c6   :  { %3833 = vmatprep.mubr.msk.f32.mxu1 %vm4105_vm1, %v4103_v10  ;;  %3841 = vmatprep.subr.mxu1 %v4103_v10  ;;  %v1530_v59 = vsel %vm1394_vm3, %v3965_v54, 0.0 }
 0x3c8   :  { %3834 = vmatmul.mubr.msk.f32.vlgmr.msra.gmra.mrb[34].mxu1 %vm1394_vm3, %v3963_v53 }
 0x3c9   :  { %3842 = vmatpush3.msra.mxu1 %v2528_v30  ;;  %1525 = vadd.xlane.f32.xlu0 %v1524_v28 }
 0x3ca   :  { %3843 = vmatprep.mubr.msk.f32.mxu1 %vm4105_vm1, %v4103_v10  ;;  %3851 = vmatprep.subr.mxu1 %v4103_v10 }
 0x3cc   :  { %3844 = vmatmul.mubr.msk.f32.vlgmr.msra.gmra.mrb[36].mxu1 %vm1394_vm3, %v3965_v54 }
 0x3cd   :  { %3852 = vmatpush3.msra.mxu1 %v2680_v56  ;;  %1531 = vadd.xlane.f32.xlu0 %v1530_v59  ;;  %v3224_v56 = vld [vmem:[#allocation7 + $0x14] sm:$0xf] }
 0x3ce   :  { %3853 = vmatprep.mubr.msk.f32.mxu1 %vm4105_vm1, %v4103_v10 }
 0x3d9   :  { %v1442_v60 = vpop.xlane.xlu0 %1441 }
 0x3da   :  { %v1458_v25 = vsub.f32 %v4478_v45, %v1442_v60 }
 0x3dc   :  { %v1489_v49 = vmul.f32 1.442695, %v1458_v25 }
 0x3dd   :  { %v2604_v61 = vpop.permute.xlu0 %2603 }
 0x3de   :  { %3966 = vpow2.f32 %v1489_v49  ;;  %3847 = vmatpush3.msra.mxu0 %v2604_v61 }
 0x3df   :  { %3849 = vmatmul.mubr.msk.f32.vlgmr.msra.gmra.mrb[24].mxu0 %vm1394_vm3, %v3959_v17  ;;  %3856 = vmatprep.subr.msk.mxu0 %vm2796_vm4, %v2789_v52 }
 0x3e0   :  { %3857 = vmatpush3.msk.msra.mxu0 %vm2796_vm4, %v2789_v52 }
 0x3e1   :  { %3861 = vmatprep.subr.msk.mxu0 %vm2796_vm4, %v2787_v0 }
 0x3e7   :  { %v1611_v58 = vpop.f32.mrb[10].mxu0 }
 0x3e8   :  { %v3967_v10 = vpop.eup %3966  ;;  %v3780_v1 = vpop.f32.mrb[11].mxu0 }
 0x3e9   :  { %3854 = vmatmul.mubr.msk.f32.vlgmr.msra.gmra.mrb[38].mxu1 %vm1394_vm3, %v3967_v10  ;;  %v1536_v45 = vsel %vm1394_vm3, %v3967_v10, 0.0  ;;  %v3312_v10 = vld [vmem:[#allocation7 + $0x18] sm:$0xf] }
 0x3ea   :  { %1537 = vadd.xlane.f32.xlu0 %v1536_v45 }
 0x3eb   :  { %v1687_v55 = vpop.f32.mrb[24].mxu1 }
 0x3ec   :  { %v3785_v2 = vpop.f32.mrb[25].mxu1 }
 0x404   :  { %v1502_v7 = vpop.xlane.xlu1 %1501 }
 0x40e   :  { %v1499_v3 = vpop.xlane.xlu0 %1498 }
 0x40f   :  { %3968 = vrcp.f32 %v1499_v3 }
 0x411   :  { %v1505_v15 = vpop.xlane.xlu1 %1504 }
 0x413   :  { %v1493_v6 = vpop.xlane.xlu0 %1492 }
 0x414   :  { %3970 = vrcp.f32 %v1493_v6 }
 0x415   :  { %3972 = vrcp.f32 %v1502_v7  ;;  %v1511_v34 = vpop.xlane.xlu1 %1510 }
 0x417   :  { %v1496_v63 = vpop.xlane.xlu0 %1495 }
 0x418   :  { %3974 = vrcp.f32 %v1496_v63 }
 0x419   :  { %v3969_v8 = vpop.eup %3968  ;;  %3976 = vrcp.f32 %v1505_v15 }
 0x41a   :  { %v1517_v18 = vpop.xlane.xlu1 %1516 }
 0x41c   :  { %v1508_v33 = vpop.xlane.xlu0 %1507 }
 0x41d   :  { %3978 = vrcp.f32 %v1508_v33  ;;  %v3590_v33 = vld [vmem:[%s4624_s3] ss:$0 sm:$0xff] }
 0x41e   :  { %v3971_v57 = vpop.eup %3970  ;;  %3980 = vrcp.f32 %v1511_v34  ;;  %v1523_v17 = vpop.xlane.xlu1 %1522 }
 0x41f   :  { %v3973_v5 = vpop.eup %3972  ;;  %v2771_v26 = vmul.f32 %v3971_v57, %v1611_v58 }
 0x422   :  { %v3975_v31 = vpop.eup %3974 }
 0x423   :  { %v2772_v32 = vmul.f32 %v3975_v31, %v1687_v55  ;;  %v3977_v35 = vpop.eup %3976 }
 0x427   :  { %v3979_v21 = vpop.eup %3978 }
 0x428   :  { %v3981_v43 = vpop.eup %3980 }
 0x445   :  { %v1763_v9 = vpop.f32.mrb[12].mxu0 }
 0x446   :  { %v2773_v13 = vmul.f32 %v3969_v8, %v1763_v9  ;;  %v3790_v14 = vpop.f32.mrb[13].mxu0  ;;  %v1529_v60 = vpop.xlane.xlu1 %1528  ;;  %v3400_v9 = vld [vmem:[#allocation7 + $0x1c] sm:$0xf] }
 0x448   :  { %3858 = vmatprep.mubr.msk.f32.mxu0 %vm179_vm2, %v2773_v13 }
 0x449   :  { %v1839_v16 = vpop.f32.mrb[26].mxu1 }
 0x44a   :  { %v2774_v22 = vmul.f32 %v3973_v5, %v1839_v16  ;;  %v3795_v23 = vpop.f32.mrb[27].mxu1  ;;  %v1514_v11 = vpop.xlane.xlu0 %1513 }
 0x44b   :  { %3982 = vrcp.f32 %v1514_v11 }
 0x44c   :  { %3859 = vmatmul.mubr.msk.f32.vlgmr.msra.gmra.mrb[26].mxu0 %vm179_vm2, %v2774_v22  ;;  %3984 = vrcp.f32 %v1517_v18 }
 0x44d   :  { %3863 = vmatprep.mubr.msk.f32.mxu0 %vm179_vm2, %v2771_v26  ;;  %3862 = vmatpush3.msk.msra.mxu0 %vm2796_vm4, %v2787_v0 }
 0x44e   :  { %3866 = vmatprep.subr.msk.mxu0 %vm2796_vm4, %v2960_v29  ;;  %v1535_v13 = vpop.xlane.xlu1 %1534 }
 0x452   :  { %v1520_v4 = vpop.xlane.xlu0 %1519 }
 0x453   :  { %3986 = vrcp.f32 %v1520_v4 }
 0x454   :  { %3864 = vmatmul.mubr.msk.f32.vlgmr.msra.gmra.mrb[26].mxu0 %vm179_vm2, %v2772_v32  ;;  %3988 = vrcp.f32 %v1523_v17 }
 0x455   :  { %3867 = vmatpush3.msk.msra.mxu0 %vm2796_vm4, %v2960_v29  ;;  %v3983_v51 = vpop.eup %3982 }
 0x456   :  { %v1915_v36 = vpop.f32.mrb[14].mxu0  ;;  %3871 = vmatprep.subr.msk.mxu0 %vm2796_vm4, %v3048_v27  ;;  %v3985_v53 = vpop.eup %3984 }
 0x457   :  { %v2775_v37 = vmul.f32 %v3977_v35, %v1915_v36  ;;  %v3800_v38 = vpop.f32.mrb[15].mxu0  ;;  %v1526_v59 = vpop.xlane.xlu0 %1525 }
 0x458   :  { %3990 = vrcp.f32 %v1526_v59 }
 0x459   :  { %3868 = vmatprep.mubr.msk.f32.mxu0 %vm179_vm2, %v2775_v37  ;;  %3992 = vrcp.f32 %v1529_v60 }
 0x45a   :  { %v2067_v20 = vpop.f32.mrb[16].mxu0 }
 0x45b   :  { %v3810_v39 = vpop.f32.mrb[17].mxu0  ;;  %v2777_v12 = vmul.f32 %v3981_v43, %v2067_v20  ;;  %v1532_v1 = vpop.xlane.xlu0 %1531 }
 0x45c   :  { %3994 = vrcp.f32 %v1532_v1 }
 0x45d   :  { %v3987_v25 = vpop.eup %3986  ;;  %3996 = vrcp.f32 %v1535_v13 }
 0x45e   :  { %v2219_v40 = vpop.f32.mrb[18].mxu0  ;;  %v3989_v52 = vpop.eup %3988 }
 0x45f   :  { %v1991_v41 = vpop.f32.mrb[28].mxu1  ;;  %v3820_v42 = vpop.f32.mrb[19].mxu0  ;;  %v2779_v54 = vmul.f32 %v3985_v53, %v2219_v40 }
 0x460   :  { %v2776_v44 = vmul.f32 %v3979_v21, %v1991_v41  ;;  %v3805_v46 = vpop.f32.mrb[29].mxu1 }
 0x462   :  { %3869 = vmatmul.mubr.msk.f32.vlgmr.msra.gmra.mrb[26].mxu0 %vm179_vm2, %v2776_v44  ;;  %v2371_v48 = vpop.f32.mrb[20].mxu0  ;;  %v3991_v2 = vpop.eup %3990 }
 0x463   :  { %3873 = vmatprep.mubr.msk.f32.mxu0 %vm179_vm2, %v2777_v12  ;;  %v3830_v62 = vpop.f32.mrb[21].mxu0  ;;  %3872 = vmatpush3.msk.msra.mxu0 %vm2796_vm4, %v3048_v27  ;;  %v2781_v58 = vmul.f32 %v3989_v52, %v2371_v48  ;;  %v3993_v6 = vpop.eup %3992 }
 0x464   :  { %3876 = vmatprep.subr.msk.mxu0 %vm2796_vm4, %v3136_v47 }
 0x466   :  { %v3995_v14 = vpop.eup %3994 }
 0x467   :  { %v3997_v15 = vpop.eup %3996 }
 0x477   :  { %v1538_v5 = vpop.xlane.xlu0 %1537 }
 0x478   :  { %3998 = vrcp.f32 %v1538_v5 }
 0x482   :  { %v3999_v26 = vpop.eup %3998 }
 0x48b   :  { %v2523_v50 = vpop.f32.mrb[22].mxu0 }
 0x48c   :  { %v3840_v19 = vpop.f32.mrb[23].mxu0  ;;  %v2783_v8 = vmul.f32 %v3993_v6, %v2523_v50 }
 0x48f   :  { %v2143_v24 = vpop.f32.mrb[30].mxu1 }
 0x490   :  { %v2778_v30 = vmul.f32 %v3983_v51, %v2143_v24  ;;  %v3815_v28 = vpop.f32.mrb[31].mxu1 }
 0x492   :  { %3874 = vmatmul.mubr.msk.f32.vlgmr.msra.gmra.mrb[26].mxu0 %vm179_vm2, %v2778_v30 }
 0x493   :  { %3878 = vmatprep.mubr.msk.f32.mxu0 %vm179_vm2, %v2779_v54  ;;  %3877 = vmatpush3.msk.msra.mxu0 %vm2796_vm4, %v3136_v47 }
 0x494   :  { %3881 = vmatprep.subr.msk.mxu0 %vm2796_vm4, %v3224_v56 }
 0x497   :  { %v2295_v49 = vpop.f32.mrb[32].mxu1 }
 0x498   :  { %v2780_v61 = vmul.f32 %v3987_v25, %v2295_v49  ;;  %v3825_v0 = vpop.f32.mrb[33].mxu1 }
 0x49a   :  { %3879 = vmatmul.mubr.msk.f32.vlgmr.msra.gmra.mrb[26].mxu0 %vm179_vm2, %v2780_v61 }
 0x49b   :  { %v2447_v45 = vpop.f32.mrb[34].mxu1  ;;  %3883 = vmatprep.mubr.msk.f32.mxu0 %vm179_vm2, %v2781_v58  ;;  %3882 = vmatpush3.msk.msra.mxu0 %vm2796_vm4, %v3224_v56 }
 0x49c   :  { %v3835_v55 = vpop.f32.mrb[35].mxu1  ;;  %3886 = vmatprep.subr.msk.mxu0 %vm2796_vm4, %v3312_v10  ;;  %v2782_v7 = vmul.f32 %v3991_v2, %v2447_v45 }
 0x49f   :  { %v2599_v3 = vpop.f32.mrb[36].mxu1 }
 0x4a0   :  { %v3845_v63 = vpop.f32.mrb[37].mxu1  ;;  %v2784_v57 = vmul.f32 %v3995_v14, %v2599_v3 }
 0x4a2   :  { %3884 = vmatmul.mubr.msk.f32.vlgmr.msra.gmra.mrb[26].mxu0 %vm179_vm2, %v2782_v7 }
 0x4a3   :  { %3888 = vmatprep.mubr.msk.f32.mxu0 %vm179_vm2, %v2783_v8  ;;  %3887 = vmatpush3.msk.msra.mxu0 %vm2796_vm4, %v3312_v10 }
 0x4a4   :  { %3891 = vmatprep.subr.msk.mxu0 %vm2796_vm4, %v3400_v9 }
 0x4aa   :  { %3889 = vmatmul.mubr.msk.f32.vlgmr.msra.gmra.mrb[26].mxu0 %vm179_vm2, %v2784_v57 }
 0x4ab   :  { %3892 = vmatpush3.msk.msra.mxu0 %vm2796_vm4, %v3400_v9 }
 0x4b2   :  { %v2675_v16 = vpop.f32.mrb[24].mxu0 }
 0x4b3   :  { %v2785_v22 = vmul.f32 %v3997_v15, %v2675_v16  ;;  %v3850_v23 = vpop.f32.mrb[25].mxu0 }
 0x4b5   :  { %3893 = vmatprep.mubr.msk.f32.mxu0 %vm179_vm2, %v2785_v22 }
 0x4bc   :  { %v2751_v29 = vpop.f32.mrb[38].mxu1 }
 0x4bd   :  { %v2786_v31 = vmul.f32 %v3999_v26, %v2751_v29  ;;  %v3855_v32 = vpop.f32.mrb[39].mxu1 }
 0x4bf   :  { %3894 = vmatmul.mubr.msk.f32.vlgmr.msra.gmra.mrb[26].mxu0 %vm179_vm2, %v2786_v31 }
 0x592   :  { %v3895_v34 = vpop.f32.mrb[26].mxu0 }
 0x593   :  { %v3495_v27 = vadd.f32 %v3895_v34, %v3590_v33  ;;  %v3476_v35 = vpop.f32.mrb[27].mxu0 }
 0x594   :  { %v3494_v36 = vadd.f32 %v3590_v33, %v3476_v35 }
 0x595   :  { %3497 = vst.msk [vmem:[#allocation8 + $0x8] sm:$0xff] %vm65_vm0, %v3495_v27 }
 0x596   :  { %3496 = vst.msk [vmem:[#allocation8] sm:$0xff] %vm65_vm0, %v3494_v36 }
 0x597   :  { %4077 = shalt.err (!%p4074_p0)
}
 0x598   :  { %s4078_s15 = scalar_lea.hbm %s4625_s4, 256 }
 0x599   :  { %p4079_p1 = scmp.ne.s32.totalorder %s4625_s4, %s4078_s15  ;;  %p4082_p2 = scmp.lt.u32.totalorder %s4078_s15, %s4625_s4 }
 0x59b   :  { %p4084_p3 = pnand %p4082_p2, %p4079_p1 }
 0x59d   :  { %4087 = shalt.err (!%p4084_p3)
}
 0x59e   :  { %3509 = dma.vmem_to_hbm [thread:$0]  %s3504_s1, 256, %s4625_s4, [#allocation4], %s4096_s27, %s4096_s27, %s4097_s28  }
 0x59f   :  { %4092 = dma.done.wait [#allocation4], 256  }
 0x5a0   :  { %4093 = vsyncadd [#allocation4], 4294967040 }
 0x5a1   :  { %3513 = vsyncpa [#allocation3], 1 }
 0x5a2   :  { %3514 = vsyncpa [#allocation6], 1 }
 0x5a3   :  { %3515 = vsyncpa [#allocation4], 1 }

</bundles_post_ra>
